<compile_context>
chip_gen: v7x
topology: tpu7x:2x2x1
jax: 0.10.0
libtpu: 0.0.40
codegen_flags: <defaults>
</compile_context>

<pallas_src>
import functools

import jax
import jax.numpy as jnp
from jax import lax
from jax.experimental import pallas as pl
from jax.experimental.pallas import tpu as pltpu

BN_EPS = 1e-5


# ------------------------------- fused kernel ------------------------------- #

def _bottleneck_kernel(x_top_ref, x_mid_ref, x_bot_ref,
                       w1_ref, w2_ref, w3_ref,
                       sb1_ref, sb2_ref, sb3_ref,
                       o_ref, *, th, w):
    """One (TH, W) row band of one image, fully fused in VMEM.

    x_top/x_bot: one-image-row halo blocks (W, Cin); x_mid: (TH*W, Cin) band.
    w2: (9, planes, planes) with tap index kh*3+kw.  sb*: (2, C) = [scale; bias].
    """
    t = pl.program_id(1)
    last_t = pl.num_programs(1) - 1
    rows = th * w

    s1, b1 = sb1_ref[0:1, :], sb1_ref[1:2, :]
    s2, b2 = sb2_ref[0:1, :], sb2_ref[1:2, :]
    s3, b3 = sb3_ref[0:1, :], sb3_ref[1:2, :]
    w1 = w1_ref[...]
    planes = w1.shape[1]

    def conv1_bn_relu(xv):
        y = jnp.dot(xv, w1, preferred_element_type=jnp.float32)
        return jnp.maximum(y * s1 + b1, 0.0)

    # ---- stage 1: 1x1 conv + bn1 + relu on the band and its 1-row halos ----
    out1_mid = conv1_bn_relu(x_mid_ref[...])                       # (rows, planes)
    # Halo rows that fall outside the image must be conv2's *zero padding*
    # (conv2 pads out1, not x), so zero them at the image boundary.
    valid_top = (t > 0).astype(jnp.float32)
    valid_bot = (t < last_t).astype(jnp.float32)
    out1_top = conv1_bn_relu(x_top_ref[...]) * valid_top           # (w, planes)
    out1_bot = conv1_bn_relu(x_bot_ref[...]) * valid_bot           # (w, planes)

    # Halo-extended conv1 output, flattened rows.  The extra zero bands keep
    # every tap's slice in-bounds (those values are masked out anyway).
    zpad = jnp.zeros((w, planes), jnp.float32)
    out1h = jnp.concatenate([zpad, out1_top, out1_mid, out1_bot, zpad], axis=0)

    # ---- stage 2: 3x3 conv (pad=1) as 9 shifted taps on the flat band ----
    # Output pixel (i, j) <- sum_{dh,dw} out1[(i+dh, j+dw)] @ W[dh+1, dw+1].
    # In flat coordinates the source of tap (dh, dw) is a contiguous slice of
    # out1h starting at (2+dh)*w + dw (sublane-offset read, no reshape).
    def tap(dh, dw):
        off = (2 + dh) * w + dw
        return jnp.dot(out1h[off:off + rows, :],
                       w2_ref[(dh + 1) * 3 + (dw + 1)],
                       preferred_element_type=jnp.float32)

    # Zero padding along W: taps reading column j-1 (j+1) are invalid at the
    # left (right) image edge.  One mask per horizontal-shift group.
    col = lax.broadcasted_iota(jnp.int32, (rows, 1), 0) % w
    mask_l = (col > 0).astype(jnp.float32)
    mask_r = (col < (w - 1)).astype(jnp.float32)

    acc_c = tap(-1, 0) + tap(0, 0) + tap(1, 0)       # dw = 0
    acc_l = tap(-1, -1) + tap(0, -1) + tap(1, -1)    # dw = -1
    acc_r = tap(-1, 1) + tap(0, 1) + tap(1, 1)       # dw = +1
    acc2 = acc_c + mask_l * acc_l + mask_r * acc_r
    out2 = jnp.maximum(acc2 * s2 + b2, 0.0)          # (rows, planes)

    # ---- stage 3: 1x1 conv + bn3 + residual add + relu ----
    y = jnp.dot(out2, w3_ref[...], preferred_element_type=jnp.float32)
    y = y * s3 + b3 + x_mid_ref[...]
    o_ref[...] = jnp.maximum(y, 0.0).astype(o_ref.dtype)


# --------------------------- tiling / VMEM sizing ---------------------------- #

def _round_up(v, m):
    return (v + m - 1) // m * m


def _padded_bytes(r, c, itemsize=4):
    # f32 VMEM tile padding: sublanes to 8, lanes to 128.
    return _round_up(max(r, 1), 8) * _round_up(max(c, 1), 128) * itemsize


def _tile_vmem_estimate(th, w, cin, planes, cout):
    rows = th * w
    # double-buffered pipelined blocks (inputs + output)
    io = 2 * (_padded_bytes(rows, cin) + 2 * _padded_bytes(w, cin)
              + _padded_bytes(rows, cout))
    # weights / folded-BN params (assume double-buffered too)
    wts = 2 * (_padded_bytes(cin, planes) + 9 * _padded_bytes(planes, planes)
               + _padded_bytes(planes, cout) + 3 * _padded_bytes(2, cout))
    # in-kernel temporaries (conv1 halo slab, accumulators, epilogue, masks)
    inter = (_padded_bytes((th + 4) * w, planes)
             + 6 * _padded_bytes(rows, planes)
             + 3 * _padded_bytes(rows, cout)
             + 2 * _padded_bytes(rows, 128))
    return io + wts + inter


def _pick_tile_rows(n, h, w, cin, planes, cout, max_tile_rows, vmem_budget):
    divisors = [d for d in range(h, 0, -1) if h % d == 0]
    th = divisors[-1]
    for d in divisors:
        if d * w <= max_tile_rows and \
                _tile_vmem_estimate(d, w, cin, planes, cout) <= vmem_budget:
            th = d
            break
    # Give the megacore (v7x: 2 TensorCores) at least 2 grid blocks if possible.
    if n * (h // th) < 2:
        smaller = [d for d in divisors if d < th]
        if smaller:
            th = smaller[0]
    return th


# ------------------------------ wrapper / glue ------------------------------- #

def _fold_bn(gamma, beta, mean, var):
    scale = gamma * lax.rsqrt(var + BN_EPS)
    bias = beta - mean * scale
    return scale.astype(jnp.float32), bias.astype(jnp.float32)


def bottleneck_forward_nhwc(x_nhwc, p, *, max_tile_rows=512,
                            vmem_tile_budget=8 * 1024 * 1024):
    """Fused Bottleneck forward, NHWC in / NHWC out (preferred hot path)."""
    N, H, W, Cin = x_nhwc.shape
    planes = p["conv1_w"].shape[0]
    cout = 4 * planes
    assert Cin == cout, "identity residual requires inplanes == 4 * planes"
    # TODO(synk): support W not a multiple of 8 (halo row blocks need 8-sublane tiles).
    assert W % 8 == 0, "W must be a multiple of 8 for the halo row blocks"

    s1, b1 = _fold_bn(p["bn1_gamma"], p["bn1_beta"], p["bn1_mean"], p["bn1_var"])
    s2, b2 = _fold_bn(p["bn2_gamma"], p["bn2_beta"], p["bn2_mean"], p["bn2_var"])
    s3, b3 = _fold_bn(p["bn3_gamma"], p["bn3_beta"], p["bn3_mean"], p["bn3_var"])
    sb1 = jnp.stack([s1, b1])                                     # (2, planes)
    sb2 = jnp.stack([s2, b2])                                     # (2, planes)
    sb3 = jnp.stack([s3, b3])                                     # (2, cout)

    w1 = p["conv1_w"][:, :, 0, 0].T.astype(jnp.float32)           # (Cin, planes)
    w2 = jnp.transpose(p["conv2_w"], (2, 3, 1, 0)).reshape(
        9, planes, planes).astype(jnp.float32)                    # (9, in, out), kh*3+kw
    w3 = p["conv3_w"][:, :, 0, 0].T.astype(jnp.float32)           # (planes, cout)

    th = _pick_tile_rows(N, H, W, Cin, planes, cout, max_tile_rows, vmem_tile_budget)
    num_t = H // th
    rows = th * W
    x2 = x_nhwc.astype(jnp.float32).reshape(N * H * W, Cin)

    est = _tile_vmem_estimate(th, W, Cin, planes, cout)
    # Explicit scoped-VMEM limit: >= 32 MiB (plenty for our tiles), and stay
    # safely under v7x's 64 MiB physical VMEM per TensorCore.
    vmem_limit = int(min(max(2 * est, 32 * 1024 * 1024), 60 * 1024 * 1024))

    flops = 2 * N * H * W * (Cin * planes + 9 * planes * planes + planes * cout)
    bytes_accessed = 4 * (x2.size + N * H * W * cout
                          + w1.size + w2.size + w3.size + 3 * 2 * cout)

    kernel = functools.partial(_bottleneck_kernel, th=th, w=W)

    out2d = pl.pallas_call(
        kernel,
        out_shape=jax.ShapeDtypeStruct((N * H * W, cout), jnp.float32),
        grid=(N, num_t),
        in_specs=[
            # 1-row halo above the band (clamped to the image's first row;
            # zeroed in-kernel when t == 0).
            pl.BlockSpec((W, Cin),
                         lambda n, t: (jnp.maximum(n * H + t * th - 1, n * H), 0)),
            # the (TH, W) row band itself (also the residual)
            pl.BlockSpec((rows, Cin), lambda n, t: (n * num_t + t, 0)),
            # 1-row halo below the band (clamped to the image's last row)
            pl.BlockSpec((W, Cin),
                         lambda n, t: (jnp.minimum(n * H + (t + 1) * th,
                                                   n * H + H - 1), 0)),
            pl.BlockSpec((Cin, planes), lambda n, t: (0, 0)),
            pl.BlockSpec((9, planes, planes), lambda n, t: (0, 0, 0)),
            pl.BlockSpec((planes, cout), lambda n, t: (0, 0)),
            pl.BlockSpec((2, planes), lambda n, t: (0, 0)),
            pl.BlockSpec((2, planes), lambda n, t: (0, 0)),
            pl.BlockSpec((2, cout), lambda n, t: (0, 0)),
        ],
        out_specs=pl.BlockSpec((rows, cout), lambda n, t: (n * num_t + t, 0)),
        compiler_params=pltpu.CompilerParams(
            dimension_semantics=("parallel", "parallel"),
            vmem_limit_bytes=vmem_limit),
        cost_estimate=pl.CostEstimate(flops=int(flops), transcendentals=0,
                                      bytes_accessed=int(bytes_accessed)),
    )(x2, x2, x2, w1, w2, w3, sb1, sb2, sb3)

    return out2d.reshape(N, H, W, cout)


def bottleneck_forward(x_nchw, p, **kw):
    """NCHW (PyTorch-layout) wrapper around the fused NHWC kernel."""
    out_nhwc = bottleneck_forward_nhwc(jnp.transpose(x_nchw, (0, 2, 3, 1)), p, **kw)
    return jnp.transpose(out_nhwc, (0, 3, 1, 2))


# -------------------------------- parameters -------------------------------- #

def init_bottleneck_params(key, inplanes, planes):
    exp = 4
    ks = jax.random.split(key, 16)

    def conv_init(k, shape):  # He-style init, deterministic
        fan_in = shape[1] * shape[2] * shape[3]
        return jax.random.normal(k, shape, jnp.float32) * (2.0 / fan_in) ** 0.5

    p = {
        "conv1_w": conv_init(ks[0], (planes, inplanes, 1, 1)),
        "conv2_w": conv_init(ks[1], (planes, planes, 3, 3)),
        "conv3_w": conv_init(ks[2], (planes * exp, planes, 1, 1)),
    }
    chans = (planes, planes, planes * exp)
    for i, c in enumerate(chans):
        base = 3 + 4 * i
        p[f"bn{i+1}_gamma"] = 1.0 + 0.1 * jax.random.normal(ks[base + 0], (c,), jnp.float32)
        p[f"bn{i+1}_beta"] = 0.1 * jax.random.normal(ks[base + 1], (c,), jnp.float32)
        p[f"bn{i+1}_mean"] = 0.05 * jax.random.normal(ks[base + 2], (c,), jnp.float32)
        p[f"bn{i+1}_var"] = 1.0 + 0.1 * jnp.abs(jax.random.normal(ks[base + 3], (c,), jnp.float32))
    return p


# ---------------------------- reference (sanity) ----------------------------- #

def reference_bottleneck(x_nchw, p):
    def conv(x, w, pad):
        return lax.conv_general_dilated(
            x, w, (1, 1), [(pad, pad), (pad, pad)],
            dimension_numbers=("NCHW", "OIHW", "NCHW"))

    def bn(x, i):
        g, b = p[f"bn{i}_gamma"], p[f"bn{i}_beta"]
        m, v = p[f"bn{i}_mean"], p[f"bn{i}_var"]
        s = g / jnp.sqrt(v + BN_EPS)
        return x * s[None, :, None, None] + (b - m * s)[None, :, None, None]

    out = jax.nn.relu(bn(conv(x_nchw, p["conv1_w"], 0), 1))
    out = jax.nn.relu(bn(conv(out, p["conv2_w"], 1), 2))
    out = bn(conv(out, p["conv3_w"], 0), 3)
    return jax.nn.relu(out + x_nchw)


# ----------------------------------- main ------------------------------------ #

if __name__ == "__main__":
    key = jax.random.PRNGKey(0)
    kx, kp = jax.random.split(key)

    inplanes, planes = 16, 4          # inplanes == 4 * planes -> identity residual
    N, H, W = 2, 16, 16

    x = jax.random.normal(kx, (N, inplanes, H, W), jnp.float32)
    params = init_bottleneck_params(kp, inplanes, planes)

    # max_tile_rows=128 -> TH=8, grid=(2, 2): exercises the halo path and gives
    # 4 parallel blocks for megacore / pipelining.
    fwd = jax.jit(functools.partial(bottleneck_forward, max_tile_rows=128))
    out = jax.block_until_ready(fwd(x, params))

    assert out.shape == (N, planes * 4, H, W), out.shape

    ref = jax.block_until_ready(reference_bottleneck(x, params))
    max_err = float(jnp.max(jnp.abs(out - ref)))
    assert jnp.allclose(out, ref, rtol=1e-2, atol=1e-2), f"max abs err = {max_err}"

    print("KERNEL_OK")
</pallas_src>

<mosaic_0001>
module attributes {stable_mosaic.version = 11 : i64} {
  func.func @_bottleneck_kernel(%arg0: i32, %arg1: i32, %arg2: memref<16x16xf32, #tpu.memory_space<vmem>>, %arg3: memref<128x16xf32, #tpu.memory_space<vmem>>, %arg4: memref<16x16xf32, #tpu.memory_space<vmem>>, %arg5: memref<16x4xf32, #tpu.memory_space<vmem>>, %arg6: memref<9x4x4xf32, #tpu.memory_space<vmem>>, %arg7: memref<4x16xf32, #tpu.memory_space<vmem>>, %arg8: memref<2x4xf32, #tpu.memory_space<vmem>>, %arg9: memref<2x4xf32, #tpu.memory_space<vmem>>, %arg10: memref<2x16xf32, #tpu.memory_space<vmem>>, %arg11: memref<128x16xf32, #tpu.memory_space<vmem>>) attributes {dimension_semantics = [#tpu.dimension_semantics<parallel>, #tpu.dimension_semantics<parallel>], iteration_bounds = array<i64: 2, 2>, scalar_prefetch = 0 : i64, scratch_operands = 0 : i64, tpu.core_type = #tpu.core_type<tc>, window_params = [{transform_indices = @transform_0, window_bounds = array<i64: 16, 16>}, {transform_indices = @transform_1, window_bounds = array<i64: 128, 16>}, {transform_indices = @transform_2, window_bounds = array<i64: 16, 16>}, {pipeline_mode = #tpu.pipeline_mode<synchronous>, transform_indices = @transform_3, window_bounds = array<i64: 16, 4>}, {pipeline_mode = #tpu.pipeline_mode<synchronous>, transform_indices = @transform_4, window_bounds = array<i64: 9, 4, 4>}, {pipeline_mode = #tpu.pipeline_mode<synchronous>, transform_indices = @transform_5, window_bounds = array<i64: 4, 16>}, {pipeline_mode = #tpu.pipeline_mode<synchronous>, transform_indices = @transform_6, window_bounds = array<i64: 2, 4>}, {pipeline_mode = #tpu.pipeline_mode<synchronous>, transform_indices = @transform_7, window_bounds = array<i64: 2, 4>}, {pipeline_mode = #tpu.pipeline_mode<synchronous>, transform_indices = @transform_8, window_bounds = array<i64: 2, 16>}, {transform_indices = @transform_9, window_bounds = array<i64: 128, 16>}]} {
    %c0 = arith.constant 0 : index
    %c0_0 = arith.constant 0 : index
    %0 = vector.load %arg8[%c0, %c0_0] : memref<2x4xf32, #tpu.memory_space<vmem>>, vector<1x4xf32>
    %c1 = arith.constant 1 : index
    %c0_1 = arith.constant 0 : index
    %1 = vector.load %arg8[%c1, %c0_1] : memref<2x4xf32, #tpu.memory_space<vmem>>, vector<1x4xf32>
    %c0_2 = arith.constant 0 : index
    %c0_3 = arith.constant 0 : index
    %2 = vector.load %arg9[%c0_2, %c0_3] : memref<2x4xf32, #tpu.memory_space<vmem>>, vector<1x4xf32>
    %c1_4 = arith.constant 1 : index
    %c0_5 = arith.constant 0 : index
    %3 = vector.load %arg9[%c1_4, %c0_5] : memref<2x4xf32, #tpu.memory_space<vmem>>, vector<1x4xf32>
    %c0_6 = arith.constant 0 : index
    %c0_7 = arith.constant 0 : index
    %4 = vector.load %arg10[%c0_6, %c0_7] : memref<2x16xf32, #tpu.memory_space<vmem>>, vector<1x16xf32>
    %c1_8 = arith.constant 1 : index
    %c0_9 = arith.constant 0 : index
    %5 = vector.load %arg10[%c1_8, %c0_9] : memref<2x16xf32, #tpu.memory_space<vmem>>, vector<1x16xf32>
    %c0_10 = arith.constant 0 : index
    %c0_11 = arith.constant 0 : index
    %6 = vector.load %arg5[%c0_10, %c0_11] : memref<16x4xf32, #tpu.memory_space<vmem>>, vector<16x4xf32>
    %c0_12 = arith.constant 0 : index
    %c0_13 = arith.constant 0 : index
    %7 = vector.load %arg3[%c0_12, %c0_13] : memref<128x16xf32, #tpu.memory_space<vmem>>, vector<128x16xf32>
    %cst = arith.constant dense<0.000000e+00> : vector<128x4xf32>
    %8 = tpu.matmul %7, %6, %cst {dimension_numbers = #tpu.dot_dimension_numbers<[1], [0], [0], [1], [0, 0, 1, 1], [], []>} : vector<128x16xf32>, vector<16x4xf32>, vector<128x4xf32> -> vector<128x4xf32>
    %9 = vector.broadcast %0 : vector<1x4xf32> to vector<128x4xf32>
    %10 = arith.mulf %8, %9 : vector<128x4xf32>
    %11 = vector.broadcast %1 : vector<1x4xf32> to vector<128x4xf32>
    %12 = arith.addf %10, %11 : vector<128x4xf32>
    %cst_14 = arith.constant 0.000000e+00 : f32
    %13 = vector.broadcast %cst_14 : f32 to vector<128x4xf32>
    %14 = arith.maximumf %12, %13 : vector<128x4xf32>
    %c0_i32 = arith.constant 0 : i32
    %15 = arith.cmpi sgt, %arg1, %c0_i32 : i32
    %16 = arith.extui %15 : i1 to i32
    %17 = arith.sitofp %16 : i32 to f32
    %c1_i32 = arith.constant 1 : i32
    %18 = arith.cmpi slt, %arg1, %c1_i32 : i32
    %19 = arith.extui %18 : i1 to i32
    %20 = arith.sitofp %19 : i32 to f32
    %c0_15 = arith.constant 0 : index
    %c0_16 = arith.constant 0 : index
    %21 = vector.load %arg2[%c0_15, %c0_16] : memref<16x16xf32, #tpu.memory_space<vmem>>, vector<16x16xf32>
    %cst_17 = arith.constant dense<0.000000e+00> : vector<16x4xf32>
    %22 = tpu.matmul %21, %6, %cst_17 {dimension_numbers = #tpu.dot_dimension_numbers<[1], [0], [0], [1], [0, 0, 1, 1], [], []>} : vector<16x16xf32>, vector<16x4xf32>, vector<16x4xf32> -> vector<16x4xf32>
    %23 = vector.broadcast %0 : vector<1x4xf32> to vector<16x4xf32>
    %24 = arith.mulf %22, %23 : vector<16x4xf32>
    %25 = vector.broadcast %1 : vector<1x4xf32> to vector<16x4xf32>
    %26 = arith.addf %24, %25 : vector<16x4xf32>
    %cst_18 = arith.constant 0.000000e+00 : f32
    %27 = vector.broadcast %cst_18 : f32 to vector<16x4xf32>
    %28 = arith.maximumf %26, %27 : vector<16x4xf32>
    %29 = vector.broadcast %17 : f32 to vector<16x4xf32>
    %30 = arith.mulf %28, %29 : vector<16x4xf32>
    %c0_19 = arith.constant 0 : index
    %c0_20 = arith.constant 0 : index
    %31 = vector.load %arg4[%c0_19, %c0_20] : memref<16x16xf32, #tpu.memory_space<vmem>>, vector<16x16xf32>
    %cst_21 = arith.constant dense<0.000000e+00> : vector<16x4xf32>
    %32 = tpu.matmul %31, %6, %cst_21 {dimension_numbers = #tpu.dot_dimension_numbers<[1], [0], [0], [1], [0, 0, 1, 1], [], []>} : vector<16x16xf32>, vector<16x4xf32>, vector<16x4xf32> -> vector<16x4xf32>
    %33 = vector.broadcast %0 : vector<1x4xf32> to vector<16x4xf32>
    %34 = arith.mulf %32, %33 : vector<16x4xf32>
    %35 = vector.broadcast %1 : vector<1x4xf32> to vector<16x4xf32>
    %36 = arith.addf %34, %35 : vector<16x4xf32>
    %cst_22 = arith.constant 0.000000e+00 : f32
    %37 = vector.broadcast %cst_22 : f32 to vector<16x4xf32>
    %38 = arith.maximumf %36, %37 : vector<16x4xf32>
    %39 = vector.broadcast %20 : f32 to vector<16x4xf32>
    %40 = arith.mulf %38, %39 : vector<16x4xf32>
    %cst_23 = arith.constant 0.000000e+00 : f32
    %41 = vector.broadcast %cst_23 : f32 to vector<16x4xf32>
    %42 = tpu.concatenate %41, %30, %14, %40, %41 in 0 : vector<16x4xf32>, vector<16x4xf32>, vector<128x4xf32>, vector<16x4xf32>, vector<16x4xf32> -> vector<192x4xf32>
    %43 = tpu.iota {dimensions = array<i32: 0>} : vector<128x1xi32>
    %c16_i32 = arith.constant 16 : i32
    %c0_i32_24 = arith.constant 0 : i32
    %44 = arith.cmpi eq, %c16_i32, %c0_i32_24 : i32
    %c1_i32_25 = arith.constant 1 : i32
    %45 = arith.select %44, %c1_i32_25, %c16_i32 : i32
    %46 = vector.broadcast %45 : i32 to vector<128x1xi32>
    %47 = arith.remsi %43, %46 : vector<128x1xi32>
    %c0_i32_26 = arith.constant 0 : i32
    %48 = vector.broadcast %c0_i32_26 : i32 to vector<128x1xi32>
    %49 = arith.cmpi ne, %47, %48 : vector<128x1xi32>
    %c0_i32_27 = arith.constant 0 : i32
    %50 = vector.broadcast %c0_i32_27 : i32 to vector<128x1xi32>
    %51 = arith.cmpi slt, %47, %50 : vector<128x1xi32>
    %c0_i32_28 = arith.constant 0 : i32
    %52 = arith.cmpi slt, %45, %c0_i32_28 : i32
    %53 = vector.broadcast %52 : i1 to vector<128x1xi1>
    %54 = vector.broadcast %53 : vector<128x1xi1> to vector<128x1xi1>
    %55 = arith.xori %51, %54 : vector<128x1xi1>
    %56 = arith.andi %55, %49 : vector<128x1xi1>
    %57 = vector.broadcast %45 : i32 to vector<128x1xi32>
    %58 = arith.addi %47, %57 : vector<128x1xi32>
    %59 = arith.select %56, %58, %47 : vector<128x1xi1>, vector<128x1xi32>
    %c0_i32_29 = arith.constant 0 : i32
    %60 = vector.broadcast %c0_i32_29 : i32 to vector<128x1xi32>
    %61 = arith.cmpi sgt, %59, %60 : vector<128x1xi32>
    %62 = arith.extui %61 : vector<128x1xi1> to vector<128x1xi32>
    %63 = arith.sitofp %62 : vector<128x1xi32> to vector<128x1xf32>
    %c15_i32 = arith.constant 15 : i32
    %64 = vector.broadcast %c15_i32 : i32 to vector<128x1xi32>
    %65 = arith.cmpi slt, %59, %64 : vector<128x1xi32>
    %66 = arith.extui %65 : vector<128x1xi1> to vector<128x1xi32>
    %67 = arith.sitofp %66 : vector<128x1xi32> to vector<128x1xf32>
    %68 = vector.extract_strided_slice %42 {offsets = [16, 0], sizes = [128, 4], strides = [1, 1]} : vector<192x4xf32> to vector<128x4xf32>
    %c1_30 = arith.constant 1 : index
    %c0_31 = arith.constant 0 : index
    %c0_32 = arith.constant 0 : index
    %69 = vector.load %arg6[%c1_30, %c0_31, %c0_32] : memref<9x4x4xf32, #tpu.memory_space<vmem>>, vector<1x4x4xf32>
    %70 = vector.shape_cast %69 : vector<1x4x4xf32> to vector<4x4xf32>
    %cst_33 = arith.constant dense<0.000000e+00> : vector<128x4xf32>
    %71 = tpu.matmul %68, %70, %cst_33 {dimension_numbers = #tpu.dot_dimension_numbers<[1], [0], [0], [1], [0, 0, 1, 1], [], []>} : vector<128x4xf32>, vector<4x4xf32>, vector<128x4xf32> -> vector<128x4xf32>
    %72 = vector.extract_strided_slice %42 {offsets = [32, 0], sizes = [128, 4], strides = [1, 1]} : vector<192x4xf32> to vector<128x4xf32>
    %c4 = arith.constant 4 : index
    %c0_34 = arith.constant 0 : index
    %c0_35 = arith.constant 0 : index
    %73 = vector.load %arg6[%c4, %c0_34, %c0_35] : memref<9x4x4xf32, #tpu.memory_space<vmem>>, vector<1x4x4xf32>
    %74 = vector.shape_cast %73 : vector<1x4x4xf32> to vector<4x4xf32>
    %cst_36 = arith.constant dense<0.000000e+00> : vector<128x4xf32>
    %75 = tpu.matmul %72, %74, %cst_36 {dimension_numbers = #tpu.dot_dimension_numbers<[1], [0], [0], [1], [0, 0, 1, 1], [], []>} : vector<128x4xf32>, vector<4x4xf32>, vector<128x4xf32> -> vector<128x4xf32>
    %76 = arith.addf %71, %75 : vector<128x4xf32>
    %77 = vector.extract_strided_slice %42 {offsets = [48, 0], sizes = [128, 4], strides = [1, 1]} : vector<192x4xf32> to vector<128x4xf32>
    %c7 = arith.constant 7 : index
    %c0_37 = arith.constant 0 : index
    %c0_38 = arith.constant 0 : index
    %78 = vector.load %arg6[%c7, %c0_37, %c0_38] : memref<9x4x4xf32, #tpu.memory_space<vmem>>, vector<1x4x4xf32>
    %79 = vector.shape_cast %78 : vector<1x4x4xf32> to vector<4x4xf32>
    %cst_39 = arith.constant dense<0.000000e+00> : vector<128x4xf32>
    %80 = tpu.matmul %77, %79, %cst_39 {dimension_numbers = #tpu.dot_dimension_numbers<[1], [0], [0], [1], [0, 0, 1, 1], [], []>} : vector<128x4xf32>, vector<4x4xf32>, vector<128x4xf32> -> vector<128x4xf32>
    %81 = arith.addf %76, %80 : vector<128x4xf32>
    %82 = vector.extract_strided_slice %42 {offsets = [15, 0], sizes = [128, 4], strides = [1, 1]} : vector<192x4xf32> to vector<128x4xf32>
    %c0_40 = arith.constant 0 : index
    %c0_41 = arith.constant 0 : index
    %c0_42 = arith.constant 0 : index
    %83 = vector.load %arg6[%c0_40, %c0_41, %c0_42] : memref<9x4x4xf32, #tpu.memory_space<vmem>>, vector<1x4x4xf32>
    %84 = vector.shape_cast %83 : vector<1x4x4xf32> to vector<4x4xf32>
    %cst_43 = arith.constant dense<0.000000e+00> : vector<128x4xf32>
    %85 = tpu.matmul %82, %84, %cst_43 {dimension_numbers = #tpu.dot_dimension_numbers<[1], [0], [0], [1], [0, 0, 1, 1], [], []>} : vector<128x4xf32>, vector<4x4xf32>, vector<128x4xf32> -> vector<128x4xf32>
    %86 = vector.extract_strided_slice %42 {offsets = [31, 0], sizes = [128, 4], strides = [1, 1]} : vector<192x4xf32> to vector<128x4xf32>
    %c3 = arith.constant 3 : index
    %c0_44 = arith.constant 0 : index
    %c0_45 = arith.constant 0 : index
    %87 = vector.load %arg6[%c3, %c0_44, %c0_45] : memref<9x4x4xf32, #tpu.memory_space<vmem>>, vector<1x4x4xf32>
    %88 = vector.shape_cast %87 : vector<1x4x4xf32> to vector<4x4xf32>
    %cst_46 = arith.constant dense<0.000000e+00> : vector<128x4xf32>
    %89 = tpu.matmul %86, %88, %cst_46 {dimension_numbers = #tpu.dot_dimension_numbers<[1], [0], [0], [1], [0, 0, 1, 1], [], []>} : vector<128x4xf32>, vector<4x4xf32>, vector<128x4xf32> -> vector<128x4xf32>
    %90 = arith.addf %85, %89 : vector<128x4xf32>
    %91 = vector.extract_strided_slice %42 {offsets = [47, 0], sizes = [128, 4], strides = [1, 1]} : vector<192x4xf32> to vector<128x4xf32>
    %c6 = arith.constant 6 : index
    %c0_47 = arith.constant 0 : index
    %c0_48 = arith.constant 0 : index
    %92 = vector.load %arg6[%c6, %c0_47, %c0_48] : memref<9x4x4xf32, #tpu.memory_space<vmem>>, vector<1x4x4xf32>
    %93 = vector.shape_cast %92 : vector<1x4x4xf32> to vector<4x4xf32>
    %cst_49 = arith.constant dense<0.000000e+00> : vector<128x4xf32>
    %94 = tpu.matmul %91, %93, %cst_49 {dimension_numbers = #tpu.dot_dimension_numbers<[1], [0], [0], [1], [0, 0, 1, 1], [], []>} : vector<128x4xf32>, vector<4x4xf32>, vector<128x4xf32> -> vector<128x4xf32>
    %95 = arith.addf %90, %94 : vector<128x4xf32>
    %96 = vector.extract_strided_slice %42 {offsets = [17, 0], sizes = [128, 4], strides = [1, 1]} : vector<192x4xf32> to vector<128x4xf32>
    %c2 = arith.constant 2 : index
    %c0_50 = arith.constant 0 : index
    %c0_51 = arith.constant 0 : index
    %97 = vector.load %arg6[%c2, %c0_50, %c0_51] : memref<9x4x4xf32, #tpu.memory_space<vmem>>, vector<1x4x4xf32>
    %98 = vector.shape_cast %97 : vector<1x4x4xf32> to vector<4x4xf32>
    %cst_52 = arith.constant dense<0.000000e+00> : vector<128x4xf32>
    %99 = tpu.matmul %96, %98, %cst_52 {dimension_numbers = #tpu.dot_dimension_numbers<[1], [0], [0], [1], [0, 0, 1, 1], [], []>} : vector<128x4xf32>, vector<4x4xf32>, vector<128x4xf32> -> vector<128x4xf32>
    %100 = vector.extract_strided_slice %42 {offsets = [33, 0], sizes = [128, 4], strides = [1, 1]} : vector<192x4xf32> to vector<128x4xf32>
    %c5 = arith.constant 5 : index
    %c0_53 = arith.constant 0 : index
    %c0_54 = arith.constant 0 : index
    %101 = vector.load %arg6[%c5, %c0_53, %c0_54] : memref<9x4x4xf32, #tpu.memory_space<vmem>>, vector<1x4x4xf32>
    %102 = vector.shape_cast %101 : vector<1x4x4xf32> to vector<4x4xf32>
    %cst_55 = arith.constant dense<0.000000e+00> : vector<128x4xf32>
    %103 = tpu.matmul %100, %102, %cst_55 {dimension_numbers = #tpu.dot_dimension_numbers<[1], [0], [0], [1], [0, 0, 1, 1], [], []>} : vector<128x4xf32>, vector<4x4xf32>, vector<128x4xf32> -> vector<128x4xf32>
    %104 = arith.addf %99, %103 : vector<128x4xf32>
    %105 = vector.extract_strided_slice %42 {offsets = [49, 0], sizes = [128, 4], strides = [1, 1]} : vector<192x4xf32> to vector<128x4xf32>
    %c8 = arith.constant 8 : index
    %c0_56 = arith.constant 0 : index
    %c0_57 = arith.constant 0 : index
    %106 = vector.load %arg6[%c8, %c0_56, %c0_57] : memref<9x4x4xf32, #tpu.memory_space<vmem>>, vector<1x4x4xf32>
    %107 = vector.shape_cast %106 : vector<1x4x4xf32> to vector<4x4xf32>
    %cst_58 = arith.constant dense<0.000000e+00> : vector<128x4xf32>
    %108 = tpu.matmul %105, %107, %cst_58 {dimension_numbers = #tpu.dot_dimension_numbers<[1], [0], [0], [1], [0, 0, 1, 1], [], []>} : vector<128x4xf32>, vector<4x4xf32>, vector<128x4xf32> -> vector<128x4xf32>
    %109 = arith.addf %104, %108 : vector<128x4xf32>
    %110 = vector.broadcast %63 : vector<128x1xf32> to vector<128x4xf32>
    %111 = arith.mulf %110, %95 : vector<128x4xf32>
    %112 = arith.addf %81, %111 : vector<128x4xf32>
    %113 = vector.broadcast %67 : vector<128x1xf32> to vector<128x4xf32>
    %114 = arith.mulf %113, %109 : vector<128x4xf32>
    %115 = arith.addf %112, %114 : vector<128x4xf32>
    %116 = vector.broadcast %2 : vector<1x4xf32> to vector<128x4xf32>
    %117 = arith.mulf %115, %116 : vector<128x4xf32>
    %118 = vector.broadcast %3 : vector<1x4xf32> to vector<128x4xf32>
    %119 = arith.addf %117, %118 : vector<128x4xf32>
    %cst_59 = arith.constant 0.000000e+00 : f32
    %120 = vector.broadcast %cst_59 : f32 to vector<128x4xf32>
    %121 = arith.maximumf %119, %120 : vector<128x4xf32>
    %c0_60 = arith.constant 0 : index
    %c0_61 = arith.constant 0 : index
    %122 = vector.load %arg7[%c0_60, %c0_61] : memref<4x16xf32, #tpu.memory_space<vmem>>, vector<4x16xf32>
    %cst_62 = arith.constant dense<0.000000e+00> : vector<128x16xf32>
    %123 = tpu.matmul %121, %122, %cst_62 {dimension_numbers = #tpu.dot_dimension_numbers<[1], [0], [0], [1], [0, 0, 1, 1], [], []>} : vector<128x4xf32>, vector<4x16xf32>, vector<128x16xf32> -> vector<128x16xf32>
    %124 = vector.broadcast %4 : vector<1x16xf32> to vector<128x16xf32>
    %125 = arith.mulf %123, %124 : vector<128x16xf32>
    %126 = vector.broadcast %5 : vector<1x16xf32> to vector<128x16xf32>
    %127 = arith.addf %125, %126 : vector<128x16xf32>
    %c0_63 = arith.constant 0 : index
    %c0_64 = arith.constant 0 : index
    %128 = vector.load %arg3[%c0_63, %c0_64] : memref<128x16xf32, #tpu.memory_space<vmem>>, vector<128x16xf32>
    %129 = arith.addf %127, %128 : vector<128x16xf32>
    %cst_65 = arith.constant 0.000000e+00 : f32
    %130 = vector.broadcast %cst_65 : f32 to vector<128x16xf32>
    %131 = arith.maximumf %129, %130 : vector<128x16xf32>
    %c0_66 = arith.constant 0 : index
    %c0_67 = arith.constant 0 : index
    %132 = vector.load %arg11[%c0_66, %c0_67] : memref<128x16xf32, #tpu.memory_space<vmem>>, vector<128x16xf32>
    tpu.vector_store %arg11[%c0_66, %c0_67], %131 {strides = array<i32>} : memref<128x16xf32, #tpu.memory_space<vmem>>, vector<128x16xf32>,
    return
  }
  func.func @transform_0(%arg0: i32, %arg1: i32) -> (i32, i32) {
    %c16_i32 = arith.constant 16 : i32
    %0 = arith.muli %arg0, %c16_i32 : i32
    %c8_i32 = arith.constant 8 : i32
    %1 = arith.muli %arg1, %c8_i32 : i32
    %2 = arith.addi %0, %1 : i32
    %c1_i32 = arith.constant 1 : i32
    %3 = arith.subi %2, %c1_i32 : i32
    %c16_i32_0 = arith.constant 16 : i32
    %4 = arith.muli %arg0, %c16_i32_0 : i32
    %5 = arith.maxsi %3, %4 : i32
    %c0_i32 = arith.constant 0 : i32
    %c0_i32_1 = arith.constant 0 : i32
    return %5, %c0_i32 : i32, i32
  }
  func.func @transform_1(%arg0: i32, %arg1: i32) -> (i32, i32) {
    %c2_i32 = arith.constant 2 : i32
    %0 = arith.muli %arg0, %c2_i32 : i32
    %1 = arith.addi %0, %arg1 : i32
    %c0_i32 = arith.constant 0 : i32
    %c0_i32_0 = arith.constant 0 : i32
    return %1, %c0_i32 : i32, i32
  }
  func.func @transform_2(%arg0: i32, %arg1: i32) -> (i32, i32) {
    %c16_i32 = arith.constant 16 : i32
    %0 = arith.muli %arg0, %c16_i32 : i32
    %c1_i32 = arith.constant 1 : i32
    %1 = arith.addi %arg1, %c1_i32 : i32
    %c8_i32 = arith.constant 8 : i32
    %2 = arith.muli %1, %c8_i32 : i32
    %3 = arith.addi %0, %2 : i32
    %c16_i32_0 = arith.constant 16 : i32
    %4 = arith.muli %arg0, %c16_i32_0 : i32
    %c16_i32_1 = arith.constant 16 : i32
    %5 = arith.addi %4, %c16_i32_1 : i32
    %c1_i32_2 = arith.constant 1 : i32
    %6 = arith.subi %5, %c1_i32_2 : i32
    %7 = arith.minsi %3, %6 : i32
    %c0_i32 = arith.constant 0 : i32
    %c0_i32_3 = arith.constant 0 : i32
    return %7, %c0_i32 : i32, i32
  }
  func.func @transform_3(%arg0: i32, %arg1: i32) -> (i32, i32) {
    %c0_i32 = arith.constant 0 : i32
    %c0_i32_0 = arith.constant 0 : i32
    %c0_i32_1 = arith.constant 0 : i32
    return %c0_i32, %c0_i32_0 : i32, i32
  }
  func.func @transform_4(%arg0: i32, %arg1: i32) -> (i32, i32, i32) {
    %c0_i32 = arith.constant 0 : i32
    %c0_i32_0 = arith.constant 0 : i32
    %c0_i32_1 = arith.constant 0 : i32
    %c0_i32_2 = arith.constant 0 : i32
    return %c0_i32, %c0_i32_0, %c0_i32_1 : i32, i32, i32
  }
  func.func @transform_5(%arg0: i32, %arg1: i32) -> (i32, i32) {
    %c0_i32 = arith.constant 0 : i32
    %c0_i32_0 = arith.constant 0 : i32
    %c0_i32_1 = arith.constant 0 : i32
    return %c0_i32, %c0_i32_0 : i32, i32
  }
  func.func @transform_6(%arg0: i32, %arg1: i32) -> (i32, i32) {
    %c0_i32 = arith.constant 0 : i32
    %c0_i32_0 = arith.constant 0 : i32
    %c0_i32_1 = arith.constant 0 : i32
    return %c0_i32, %c0_i32_0 : i32, i32
  }
  func.func @transform_7(%arg0: i32, %arg1: i32) -> (i32, i32) {
    %c0_i32 = arith.constant 0 : i32
    %c0_i32_0 = arith.constant 0 : i32
    %c0_i32_1 = arith.constant 0 : i32
    return %c0_i32, %c0_i32_0 : i32, i32
  }
  func.func @transform_8(%arg0: i32, %arg1: i32) -> (i32, i32) {
    %c0_i32 = arith.constant 0 : i32
    %c0_i32_0 = arith.constant 0 : i32
    %c0_i32_1 = arith.constant 0 : i32
    return %c0_i32, %c0_i32_0 : i32, i32
  }
  func.func @transform_9(%arg0: i32, %arg1: i32) -> (i32, i32) {
    %c2_i32 = arith.constant 2 : i32
    %0 = arith.muli %arg0, %c2_i32 : i32
    %1 = arith.addi %0, %arg1 : i32
    %c0_i32 = arith.constant 0 : i32
    %c0_i32_0 = arith.constant 0 : i32
    return %1, %c0_i32 : i32, i32
  }
}

</mosaic_0001>

<bundles_post_ra>
// kernel: bottleneck_forward.1
= control target key start
LH: loop header
LB: loop body
LE: loop exit
PB: predicated region body
PF: predicated region fallthrough
CT: control target
= control target key end

     0   :  { %s4421_s30 = smov 0   ;;  %s4423_s10 = smov 0   ;;  %s5408_s0 = inlined_call_operand.vmem [shape: f32[512,16], index: 0, kind: input, shape index: {}, may-alias: {0,1,2}]   ;;  %s5409_s1 = inlined_call_operand.vmem [shape: f32[512,16], index: 1, kind: input, shape index: {}, may-alias: {0,1,2}]   ;;  %s5410_s2 = inlined_call_operand.vmem [shape: f32[512,16], index: 2, kind: input, shape index: {}, may-alias: {0,1,2}]   ;;  %s5411_s3 = inlined_call_operand.vmem [shape: f32[16,4], index: 3, kind: input, shape index: {}]   ;;  %s5412_s4 = inlined_call_operand.vmem [shape: f32[9,4,4], index: 4, kind: input, shape index: {}]   ;;  %s5413_s5 = inlined_call_operand.vmem [shape: f32[4,16], index: 5, kind: input, shape index: {}]   ;;  %s5414_s6 = inlined_call_operand.vmem [shape: f32[2,4], index: 6, kind: input, shape index: {}]   ;;  %s5415_s7 = inlined_call_operand.vmem [shape: f32[2,4], index: 7, kind: input, shape index: {}]   ;;  %s5416_s8 = inlined_call_operand.vmem [shape: f32[2,16], index: 8, kind: input, shape index: {}]   ;;  %s5417_s9 = inlined_call_operand.vmem [shape: f32[512,16], index: 9, kind: output, shape index: {}]  }
   0x1   :  { %s4425_s11 = smov 0   ;;  %s4427_s12 = smov 0  }
   0x2   :  { %s4429_s13 = smov 0  }
   0x3 LB: > { %s28_s14 = sadd.s32 1, %s4360_s11  ;;  %s31_s15 = sadd.s32 1, %s4364_s12  ;;  %s4368_s13 = sphi %s4429_s13, %s19_s13   ;;  %s4364_s12 = sphi %s4427_s12, %s5433_s12   ;;  %s4360_s11 = sphi %s4425_s11, %s5432_s11   ;;  %s4356_s10 = sphi %s4423_s10, %s5431_s10   ;;  %s4352_s30 = sphi %s4421_s30, %s5430_s30  }
   0x4   : > { %p29_p0 = scmp.ge.s32.totalorder %s28_s14, 2  ;;  %p3421_p1 = scmp.ge.s32.totalorder %s4368_s13, 1 }
   0x5   : > { %p386_p2 = scmp.lt.s32.totalorder %s4368_s13, 5 }
   0x6   : > { %s5435_s14 = smov (%p29_p0, %s28_s14), 0  ;;  %s5437_s15 = smov (!%p29_p0, %s31_s15), %s4364_s12 }
   0x7   : > { %p387_p3 = pnand %p3421_p1, %p386_p2  ;;  %p33_p4 = scmp.ge.s32.totalorder %s5437_s15, 2 }
   0x9   : > { %s5439_s15 = smov (%p33_p4, %s5437_s15), 0  ;;  %390 = sbr.rel (%p387_p3) target bundleno = 878 (0x36e), region = 56 }
  0x10   : > { %v513_v0 = vld [vmem:[%s5411_s3] sm:$0xff]  ;;  %v514_v1 = vld [vmem:[%s5411_s3 + $0x8] sm:$0xff]  ;;  %s3427_s20 = sshll.u32 %s4356_s10, 1  ;;  %s4459_s21 = sshll.u32 %s4356_s10, 4  ;;  %vm531_vm0 = vcmask 130048   ;;  %vm1329_vm1 = vcmask 1043456  }
  0x11   : > { %v4163_v2 = vpack.c.bf16 %v514_v1, %v513_v0  ;;  %s468_s22 = sadd.s32 %s4352_s30, %s3427_s20  ;;  %s3423_s23 = sshll.u32 %s4352_s30, 3  ;;  %v3476_v23 = vld [vmem:[%s5412_s4 + $0x10] sm:$0xf]  ;;  %v3529_v24 = vld [vmem:[%s5412_s4 + $0xc] sm:$0xf]  ;;  %vm1280_vm2 = vcmask 31744  }
  0x12   : > { %s3428_s24 = sshll.u32 %s468_s22, 4  ;;  %s451_s25 = sadd.s32 %s3423_s23, %s4459_s21  ;;  %v4534_v25 = vld [vmem:[%s5412_s4 + $0x4] sm:$0xf]  ;;  %v4542_v26 = vld [vmem:[%s5414_s6] ss:$0 sm:$0xff]  ;;  %vm1807_vm3 = vcmask 1040384  }
  0x13   : > { %4164 = vmatprep.subr.bf16.mxu0 %v4163_v2  ;;  %p470_p5 = scmp.lt.s32.totalorder %s3428_s24, 63  ;;  %4168 = vmatprep.subr.bf16.mxu1 %v4163_v2  ;;  %s3424_s26 = sadd.s32 4294967295, %s451_s25  ;;  %v4548_v27 = vld [vmem:[%s5414_s6 + $0x1] ss:$0 sm:$0xff]  ;;  %vm2356_vm4 = vcmask 1046528  }
  0x14   : > { %4166 = vmatpush3.bf16.msra.mxu0 %v4163_v2  ;;  %4170 = vmatpush3.bf16.msra.mxu1 %v4163_v2  ;;  %p453_p6 = scmp.gt.s32.totalorder %s3424_s26, %s4459_s21  ;;  %s3664_s27 = sadd.s32 8, %s3423_s23  ;;  %v4577_v49 = vld [vmem:[%s5412_s4] sm:$0xf] }
  0x15   : > { %s5441_s24 = smov (!%p470_p5, %s3428_s24), 63  ;;  %4172 = vmatprep.subr.bf16.mxu1 %v4163_v2  ;;  %s480_s29 = sadd.s32 %s3664_s27, %s4459_s21  ;;  %3903 = vmatprep.subr.msk.mxu0 %vm1329_vm1, %v3476_v23 }
  0x16   : > { %s5443_s26 = smov (!%p453_p6, %s3424_s26), %s4459_s21  ;;  %s3429_s28 = sshll.u32 %s5441_s24, 3 }
  0x17   : > { %s4475_s17 = scalar_lea.vmem %s5409_s1, %s3429_s28  ;;  %s3425_s18 = sshll.u32 %s5443_s26, 1 }
  0x18   : > { %v515_v3 = vld [vmem:[%s4475_s17] sm:$0xff]  ;;  %v516_v4 = vld [vmem:[%s4475_s17 + $0x8] sm:$0xff]  ;;  %v517_v5 = vld [vmem:[%s4475_s17 + $0x10] sm:$0xff]  ;;  %s481_s19 = sadd.s32 15, %s4459_s21  ;;  %p456_p7 = scmp.lt.s32.totalorder %s3425_s18, 63 }
  0x19   : > { %3865 = vmatprep.mubr.msk.f32.mxu0 %vm531_vm0, %v515_v3  ;;  %p482_p8 = scmp.lt.s32.totalorder %s480_s29, %s481_s19  ;;  %v518_v6 = vld [vmem:[%s4475_s17 + $0x18] sm:$0xff]  ;;  %v519_v7 = vld [vmem:[%s4475_s17 + $0x20] sm:$0xff]  ;;  %v520_v10 = vld [vmem:[%s4475_s17 + $0x28] sm:$0xff]  ;;  %p781_p10 = scmp.gt.s32.totalorder %s4352_s30, 0 }
  0x1a   : > { %3866 = vmatmul.mubr.msk.f32.vlgmr.msra.gmra.mrb[0].mxu0 %vm531_vm0, %v516_v4  ;;  %s5445_s18 = smov (!%p456_p7, %s3425_s18), 63  ;;  %v521_v11 = vld [vmem:[%s4475_s17 + $0x30] sm:$0xff]  ;;  %v522_v12 = vld [vmem:[%s4475_s17 + $0x38] sm:$0xff]  ;;  %v523_v13 = vld [vmem:[%s4475_s17 + $0x40] sm:$0xff]  ;;  %p784_p11 = scmp.lt.s32.totalorder %s4352_s30, 1 }
  0x1b   : > { %3868 = vmatprep.mubr.msk.f32.mxu0 %vm531_vm0, %v517_v5  ;;  %s5447_s29 = smov (!%p482_p8, %s480_s29), %s481_s19  ;;  %s3426_s20 = sshll.u32 %s5445_s18, 3  ;;  %v524_v16 = vld [vmem:[%s4475_s17 + $0x48] sm:$0xff]  ;;  %v525_v17 = vld [vmem:[%s4475_s17 + $0x50] sm:$0xff]  ;;  %v526_v18 = vld [vmem:[%s4475_s17 + $0x58] sm:$0xff]  ;;  %3904 = vmatpush3.msk.msra.mxu0 %vm1329_vm1, %v3476_v23 }
  0x1c   : > { %s459_s23 = scalar_lea.vmem %s5408_s0, %s3426_s20  ;;  %s3432_s25 = sshll.u32 %s5447_s29, 1  ;;  %v527_v19 = vld [vmem:[%s4475_s17 + $0x60] sm:$0xff]  ;;  %v528_v20 = vld [vmem:[%s4475_s17 + $0x68] sm:$0xff]  ;;  %v529_v21 = vld [vmem:[%s4475_s17 + $0x70] sm:$0xff]  ;;  %3981 = vmatprep.subr.msk.mxu0 %vm1329_vm1, %v3529_v24 }
  0x1d   : > { %v787_v8 = vld [vmem:[%s459_s23] sm:$0xff]  ;;  %v788_v9 = vld [vmem:[%s459_s23 + $0x8] sm:$0xff]  ;;  %p485_p9 = scmp.lt.s32.totalorder %s3432_s25, 63  ;;  %v530_v22 = vld [vmem:[%s4475_s17 + $0x78] sm:$0xff] }
  0x1e   : > { %3869 = vmatmul.mubr.msk.f32.gmra.mrb[2].mxu0 %vm531_vm0, %v518_v6  ;;  %3893 = vmatprep.mubr.msk.f32.mxu1 %vm531_vm0, %v787_v8  ;;  %s4551_s29 = scalar_select %p781_p10, 1, 0 }
  0x1f   : > { %3871 = vmatprep.mubr.msk.f32.mxu0 %vm531_vm0, %v519_v7  ;;  %3894 = vmatmul.mubr.msk.f32.vlgmr.msra.gmra.mrb[0].mxu1 %vm531_vm0, %v788_v9  ;;  %s5449_s25 = smov (!%p485_p9, %s3432_s25), 63 }
  0x20   : > { %4174 = vmatpush3.bf16.msra.mxu1 %v4163_v2  ;;  %s3433_s26 = sshll.u32 %s5449_s25, 3  ;;  %s783_s30 = scvt.s32.f32 %s4551_s29 }
  0x21   : > { %s488_s10 = scalar_lea.vmem %s5410_s2, %s3433_s26  ;;  %4175 = vmatprep.subr.msk.mxu1 %vm1329_vm1, %v3476_v23 }
  0x22   : > { %3872 = vmatmul.mubr.msk.f32.gmra.mrb[4].mxu0 %vm531_vm0, %v520_v10  ;;  %v879_v14 = vld [vmem:[%s488_s10] sm:$0xff]  ;;  %v880_v15 = vld [vmem:[%s488_s10 + $0x8] sm:$0xff]  ;;  %s4555_s10 = scalar_select %p784_p11, 1, 0  ;;  %v876_v52 = vstv %s783_s30 }
  0x23   : > { %3874 = vmatprep.mubr.msk.f32.mxu0 %vm531_vm0, %v521_v11  ;;  %3900 = vmatprep.mubr.msk.f32.mxu1 %vm531_vm0, %v879_v14  ;;  %s5317_s30 = scalar_lea.vmem %s5417_s9, %s3429_s28 }
  0x24   : > { %3901 = vmatmul.mubr.msk.f32.vlgmr.msra.gmra.mrb[2].mxu1 %vm531_vm0, %v880_v15  ;;  %s786_s16 = scvt.s32.f32 %s4555_s10 }
  0x25   : > { %4176 = vmatpush3.msk.msra.mxu1 %vm1329_vm1, %v3476_v23 }
  0x26   : > { %3875 = vmatmul.mubr.msk.f32.gmra.mrb[6].mxu0 %vm531_vm0, %v522_v12  ;;  %3929 = vmatprep.subr.msk.mxu1 %vm1329_vm1, %v4534_v25  ;;  %v4596_v62 = vstv %s786_s16 }
  0x27   : > { %3877 = vmatprep.mubr.msk.f32.mxu0 %vm531_vm0, %v523_v13 }
  0x2a   : > { %3878 = vmatmul.mubr.msk.f32.gmra.mrb[8].mxu0 %vm531_vm0, %v524_v16 }
  0x2b   : > { %3880 = vmatprep.mubr.msk.f32.mxu0 %vm531_vm0, %v525_v17 }
  0x2e   : > { %3881 = vmatmul.mubr.msk.f32.gmra.mrb[10].mxu0 %vm531_vm0, %v526_v18 }
  0x2f   : > { %3883 = vmatprep.mubr.msk.f32.mxu0 %vm531_vm0, %v527_v19 }
  0x32   : > { %3884 = vmatmul.mubr.msk.f32.gmra.mrb[12].mxu0 %vm531_vm0, %v528_v20 }
  0x33   : > { %3886 = vmatprep.mubr.msk.f32.mxu0 %vm531_vm0, %v529_v21 }
  0x36   : > { %3887 = vmatmul.mubr.msk.f32.gmra.mrb[14].mxu0 %vm531_vm0, %v530_v22 }
  0xed   : > { %v3867_v28 = vpop.f32.mrb[0].mxu0 }
  0xee   : > { %v730_v29 = vmul.f32 %v3867_v28, %v4542_v26  ;;  %v646_v30 = vpop.f32.mrb[1].mxu0 }
  0xef   : > { %v729_v31 = vmul.f32 %v4542_v26, %v646_v30 }
  0xf0   : > { %v750_v32 = vadd.f32 %v4548_v27, %v730_v29 }
  0xf1   : > { %v749_v33 = vadd.f32 %v4548_v27, %v729_v31  ;;  %v3870_v34 = vpop.f32.mrb[2].mxu0 }
  0xf2   : > { %v4558_v35 = vmax.f32 %v750_v32, 0.0  ;;  %v732_v36 = vmul.f32 %v3870_v34, %v4542_v26  ;;  %v656_v37 = vpop.f32.mrb[3].mxu0  ;;  %v3895_v42 = vpop.f32.mrb[0].mxu1 }
  0xf3   : > { %v4562_v38 = vmax.f32 %v749_v33, 0.0  ;;  %v731_v39 = vmul.f32 %v4542_v26, %v656_v37  ;;  %v871_v45 = vmul.f32 %v3895_v42, %v4542_v26  ;;  %v861_v47 = vpop.f32.mrb[1].mxu1 }
  0xf4   : > { %v1811_v40 = vrot.slane %v4558_v35, 7  ;;  %v752_v41 = vadd.f32 %v4548_v27, %v732_v36  ;;  %v2358_v43 = vrot.slane %v4558_v35, 1  ;;  %v870_v55 = vmul.f32 %v4542_v26, %v861_v47 }
  0xf5   : > { %v751_v44 = vadd.f32 %v4548_v27, %v731_v39  ;;  %v3873_v46 = vpop.f32.mrb[4].mxu0  ;;  %3905 = vmatprep.mubr.msk.f32.mxu0 %vm1280_vm2, %v4562_v38  ;;  %v1809_v48 = vrot.slane %v4562_v38, 7  ;;  %v5419_v50 = vrot.slane %v4562_v38, 1  ;;  %v873_v57 = vadd.f32 %v4548_v27, %v871_v45 }
  0xf6   : > { %v4580_v51 = vmax.f32 %v752_v41, 0.0  ;;  %v734_v53 = vmul.f32 %v3873_v46, %v4542_v26  ;;  %v666_v54 = vpop.f32.mrb[5].mxu0  ;;  %3906 = vmatmul.mubr.msk.f32.vlgmr.msra.gmra.mrb[16].mxu0 %vm1280_vm2, %v4558_v35  ;;  %v872_v61 = vadd.f32 %v4548_v27, %v870_v55 }
  0xf7   : > { %v4586_v56 = vmax.f32 %v751_v44, 0.0  ;;  %v733_v58 = vmul.f32 %v4542_v26, %v666_v54  ;;  %3982 = vmatpush3.msk.msra.mxu0 %vm1329_vm1, %v3529_v24  ;;  %v4592_v59 = vsel %vm1807_vm3, %v1809_v48, %v1811_v40  ;;  %v4605_v63 = vsel %vm2356_vm4, %v5419_v50, %v2358_v43  ;;  %v3902_v9 = vpop.f32.mrb[2].mxu1 }
  0xf8   : > { %v754_v60 = vadd.f32 %v4548_v27, %v734_v53  ;;  %4007 = vmatprep.subr.msk.mxu0 %vm1329_vm1, %v4577_v49  ;;  %v875_v0 = vmax.f32 %v873_v57, 0.0  ;;  %v1815_v4 = vrot.slane %v4580_v51, 7  ;;  %v874_v8 = vmax.f32 %v872_v61, 0.0  ;;  %v953_v15 = vpop.f32.mrb[3].mxu1 }
  0xf9   : > { %v753_v1 = vadd.f32 %v4548_v27, %v733_v58  ;;  %v3876_v2 = vpop.f32.mrb[6].mxu0  ;;  %3908 = vmatprep.mubr.msk.f32.mxu0 %vm1280_vm2, %v4586_v56  ;;  %v1813_v3 = vrot.slane %v4586_v56, 7  ;;  %v2360_v10 = vrot.slane %v4586_v56, 1  ;;  %v963_v14 = vmul.f32 %v3902_v9, %v4542_v26 }
  0xfa   : > { %v4612_v5 = vmax.f32 %v754_v60, 0.0  ;;  %v736_v6 = vmul.f32 %v3876_v2, %v4542_v26  ;;  %v676_v7 = vpop.f32.mrb[7].mxu0  ;;  %3909 = vmatmul.mubr.msk.f32.gmra.mrb[18].mxu0 %vm1280_vm2, %v4580_v51  ;;  %v4618_v11 = vmul.f32 %v876_v52, %v875_v0  ;;  %v962_v17 = vmul.f32 %v4542_v26, %v953_v15 }
  0xfb   : > { %v4620_v12 = vmax.f32 %v753_v1, 0.0  ;;  %v735_v13 = vmul.f32 %v4542_v26, %v676_v7  ;;  %v4627_v18 = vsel %vm1807_vm3, %v1811_v40, %v1813_v3  ;;  %v2362_v19 = vrot.slane %v4580_v51, 1 }
  0xfc   : > { %v756_v16 = vadd.f32 %v4548_v27, %v736_v6  ;;  %v965_v22 = vadd.f32 %v4548_v27, %v963_v14  ;;  %v1808_v23 = vrot.slane %v4618_v11, 7  ;;  %v4636_v24 = vsel %vm1807_vm3, %v1813_v3, %v1815_v4 }
  0xfd   : > { %v755_v20 = vadd.f32 %v4548_v27, %v735_v13  ;;  %v3879_v21 = vpop.f32.mrb[8].mxu0  ;;  %3911 = vmatprep.mubr.msk.f32.mxu0 %vm1280_vm2, %v4620_v12  ;;  %v964_v31 = vadd.f32 %v4548_v27, %v962_v17  ;;  %v1817_v32 = vrot.slane %v4620_v12, 7  ;;  %v4652_v40 = vmul.f32 %v876_v52, %v874_v8 }
  0xfe   : > { %v4638_v28 = vmax.f32 %v756_v16, 0.0  ;;  %v738_v29 = vmul.f32 %v3879_v21, %v4542_v26  ;;  %v686_v30 = vpop.f32.mrb[9].mxu0  ;;  %3912 = vmatmul.mubr.msk.f32.gmra.mrb[20].mxu0 %vm1280_vm2, %v4612_v5  ;;  %v967_v36 = vmax.f32 %v965_v22, 0.0  ;;  %v4649_v37 = vsel %vm1807_vm3, %v1808_v23, %v1809_v48 }
  0xff   : > { %v4645_v33 = vmax.f32 %v755_v20, 0.0  ;;  %v737_v34 = vmul.f32 %v4542_v26, %v686_v30  ;;  %v4655_v41 = vsel %vm1807_vm3, %v1815_v4, %v1817_v32  ;;  %v1819_v42 = vrot.slane %v4612_v5, 7 }
 0x100   : > { %v758_v39 = vadd.f32 %v4548_v27, %v738_v29  ;;  %v966_v46 = vmax.f32 %v964_v31, 0.0  ;;  %v1823_v48 = vrot.slane %v4638_v28, 7  ;;  %v4669_v55 = vmul.f32 %v4596_v62, %v967_v36 }
 0x101   : > { %v757_v44 = vadd.f32 %v4548_v27, %v737_v34  ;;  %v3882_v45 = vpop.f32.mrb[10].mxu0  ;;  %3914 = vmatprep.mubr.msk.f32.mxu0 %vm1280_vm2, %v4645_v33  ;;  %v1821_v47 = vrot.slane %v4645_v33, 7  ;;  %v4672_v57 = vsel %vm1807_vm3, %v1817_v32, %v1819_v42  ;;  %v5418_v3 = vrot.slane %v4652_v40, 7  ;;  %v4735_v34 = vld [vmem:[%s5412_s4 + $0x1c] sm:$0xf] }
 0x102   : > { %v4663_v53 = vmax.f32 %v758_v39, 0.0  ;;  %v740_v52 = vmul.f32 %v3882_v45, %v4542_v26  ;;  %v696_v54 = vpop.f32.mrb[11].mxu0  ;;  %3915 = vmatmul.mubr.msk.f32.gmra.mrb[22].mxu0 %vm1280_vm2, %v4638_v28  ;;  %v4689_v4 = vsel %vm2356_vm4, %v2358_v43, %v2360_v10  ;;  %v4696_v9 = vsel %vm2356_vm4, %v2360_v10, %v2362_v19 }
 0x103   : > { %v4674_v58 = vmax.f32 %v757_v44, 0.0  ;;  %v739_v60 = vmul.f32 %v4542_v26, %v696_v54  ;;  %v4678_v61 = vsel %vm1807_vm3, %v1819_v42, %v1821_v47  ;;  %v4681_v0 = vsel %vm1807_vm3, %v1821_v47, %v1823_v48 }
 0x104   : > { %v760_v1 = vadd.f32 %v4548_v27, %v740_v52  ;;  %v1827_v2 = vrot.slane %v4663_v53, 7  ;;  %v2364_v13 = vrot.slane %v4620_v12, 1  ;;  %v4705_v43 = vmul.f32 %v4596_v62, %v966_v46  ;;  %v4750_v46 = vld [vmem:[%s5412_s4 + $0x18] sm:$0xf] }
 0x105   : > { %v759_v6 = vadd.f32 %v4548_v27, %v739_v60  ;;  %v3885_v7 = vpop.f32.mrb[12].mxu0  ;;  %3917 = vmatprep.mubr.msk.f32.mxu0 %vm1280_vm2, %v4674_v58  ;;  %v1825_v8 = vrot.slane %v4674_v58, 7  ;;  %v4710_v17 = vsel %vm1807_vm3, %v5418_v3, %v1808_v23  ;;  %v2366_v30 = vrot.slane %v4612_v5, 1 }
 0x106   : > { %v4699_v14 = vmax.f32 %v760_v1, 0.0  ;;  %v742_v15 = vmul.f32 %v3885_v7, %v4542_v26  ;;  %v706_v16 = vpop.f32.mrb[13].mxu0  ;;  %3918 = vmatmul.mubr.msk.f32.gmra.mrb[24].mxu0 %vm1280_vm2, %v4663_v53  ;;  %v4726_v23 = vsel %vm2356_vm4, %v2362_v19, %v2364_v13  ;;  %v2368_v39 = vrot.slane %v4645_v33, 1 }
 0x107   : > { %v4712_v10 = vmax.f32 %v759_v6, 0.0  ;;  %v741_v20 = vmul.f32 %v4542_v26, %v706_v16  ;;  %3983 = vmatprep.mubr.msk.f32.mxu0 %vm1280_vm2, %v4649_v37  ;;  %v4718_v21 = vsel %vm1807_vm3, %v1823_v48, %v1825_v8  ;;  %v4721_v22 = vsel %vm1807_vm3, %v1825_v8, %v1827_v2 }
 0x108   : > { %v762_v62 = vadd.f32 %v4548_v27, %v742_v15  ;;  %v1831_v29 = vrot.slane %v4699_v14, 7  ;;  %v2370_v19 = vrot.slane %v4638_v28, 1  ;;  %v4753_v47 = vsel %vm2356_vm4, %v2364_v13, %v2366_v30 }
 0x109   : > { %v761_v31 = vadd.f32 %v4548_v27, %v741_v20  ;;  %v3888_v32 = vpop.f32.mrb[14].mxu0  ;;  %3920 = vmatprep.mubr.msk.f32.mxu1 %vm1280_vm2, %v4712_v10  ;;  %v1829_v36 = vrot.slane %v4712_v10, 7  ;;  %v2372_v48 = vrot.slane %v4674_v58, 1  ;;  %v2182_v16 = vrot.slane %v4669_v55, 7 }
 0x10a   : > { %v4740_v42 = vmax.f32 %v762_v62, 0.0  ;;  %v744_v44 = vmul.f32 %v3888_v32, %v4542_v26  ;;  %v716_v45 = vpop.f32.mrb[15].mxu0  ;;  %3921 = vmatmul.mubr.msk.f32.vlgmr.msra.gmra.mrb[4].mxu1 %vm1280_vm2, %v4699_v14  ;;  %3984 = vmatmul.mubr.msk.f32.vlgmr.msra.gmra.mrb[26].mxu0 %vm1280_vm2, %v4592_v59  ;;  %v2376_v20 = vrot.slane %v4712_v10, 1  ;;  %v2378_v32 = vrot.slane %v4699_v14, 1 }
 0x10b   : > { %v4756_v52 = vmax.f32 %v761_v31, 0.0  ;;  %v743_v54 = vmul.f32 %v4542_v26, %v716_v45  ;;  %3930 = vmatpush3.msk.msra.mxu1 %vm1329_vm1, %v4534_v25  ;;  %3986 = vmatprep.mubr.msk.f32.mxu0 %vm1280_vm2, %v4627_v18  ;;  %v4764_v60 = vsel %vm1807_vm3, %v1827_v2, %v1829_v36  ;;  %v4767_v1 = vsel %vm1807_vm3, %v1829_v36, %v1831_v29 }
 0x10c   : > { %v764_v6 = vadd.f32 %v4548_v27, %v744_v44  ;;  %3955 = vmatprep.subr.msk.mxu1 %vm1329_vm1, %v4735_v34  ;;  %v1835_v7 = vrot.slane %v4740_v42, 7  ;;  %4008 = vmatpush3.msk.msra.mxu0 %vm1329_vm1, %v4577_v49  ;;  %v4776_v25 = vsel %vm2356_vm4, %v2366_v30, %v2368_v39  ;;  %v4779_v26 = vsel %vm2356_vm4, %v2368_v39, %v2370_v19 }
 0x10d   : > { %v763_v2 = vadd.f32 %v4548_v27, %v743_v54  ;;  %3923 = vmatprep.mubr.msk.f32.mxu1 %vm1280_vm2, %v4756_v52  ;;  %v1833_v8 = vrot.slane %v4756_v52, 7  ;;  %4033 = vmatprep.subr.msk.mxu0 %vm1329_vm1, %v4750_v46  ;;  %v4788_v13 = vsel %vm2356_vm4, %v2370_v19, %v2372_v48  ;;  %v2180_v49 = vrot.slane %v4705_v43, 7 }
 0x10e   : > { %v4791_v15 = vmax.f32 %v764_v6, 0.0  ;;  %3924 = vmatmul.mubr.msk.f32.gmra.mrb[6].mxu1 %vm1280_vm2, %v4740_v42  ;;  %3987 = vmatmul.mubr.msk.f32.gmra.mrb[28].mxu0 %vm1280_vm2, %v4636_v24  ;;  %v2374_v27 = vrot.slane %v4663_v53, 1  ;;  %v4825_v45 = vsel %vm2356_vm4, %v2376_v20, %v2378_v32  ;;  %v2380_v54 = vrot.slane %v4756_v52, 1 }
 0x10f   : > { %v4800_v62 = vmax.f32 %v763_v2, 0.0  ;;  %3989 = vmatprep.mubr.msk.f32.mxu0 %vm1280_vm2, %v4655_v41  ;;  %v4805_v30 = vsel %vm1807_vm3, %v1831_v29, %v1833_v8  ;;  %v4808_v31 = vsel %vm1807_vm3, %v1833_v8, %v1835_v7  ;;  %v4816_v19 = vsel %vm1807_vm3, %v2180_v49, %v2182_v16  ;;  %5423 = vst [vmem:[#allocation3_spill] sm:$0xff] %v4825_v45 }
 0x110   : > { %v1839_v36 = vrot.slane %v4791_v15, 7  ;;  %v4813_v39 = vsel %vm2356_vm4, %v2372_v48, %v2374_v27  ;;  %v4819_v44 = vsel %vm2356_vm4, %v2374_v27, %v2376_v20  ;;  %v2382_v6 = vrot.slane %v4740_v42, 1 }
 0x111   : > { %5422 = vst [vmem:[#allocation2_spill] sm:$0xff] %v4819_v44  ;;  %3926 = vmatprep.mubr.msk.f32.mxu1 %vm1280_vm2, %v4800_v62  ;;  %v1837_v29 = vrot.slane %v4800_v62, 7  ;;  %v2384_v2 = vrot.slane %v4800_v62, 1  ;;  %v2386_v8 = vrot.slane %v4791_v15, 1  ;;  %v2388_v27 = vrot.slane %v4705_v43, 1 }
 0x112   : > { %3927 = vmatmul.mubr.msk.f32.gmra.mrb[8].mxu1 %vm1280_vm2, %v4791_v15  ;;  %3990 = vmatmul.mubr.msk.f32.gmra.mrb[30].mxu0 %vm1280_vm2, %v4672_v57  ;;  %v4834_v48 = vsel %vm1807_vm3, %v1839_v36, %v2180_v49  ;;  %v4850_v49 = vsel %vm2356_vm4, %v2378_v32, %v2380_v54  ;;  %v2570_v3 = vrot.slane %v4652_v40, 1  ;;  %v4854_v50 = vsel %vm2356_vm4, %v2380_v54, %v2382_v6 }
 0x113   : > { %3992 = vmatprep.mubr.msk.f32.mxu0 %vm1280_vm2, %v4678_v61  ;;  %3931 = vmatprep.mubr.msk.f32.mxu1 %vm1280_vm2, %v4652_v40  ;;  %v4844_v16 = vsel %vm1807_vm3, %v1835_v7, %v1837_v29  ;;  %v4847_v20 = vsel %vm1807_vm3, %v1837_v29, %v1839_v36  ;;  %v4857_v45 = vsel %vm2356_vm4, %v2382_v6, %v2384_v2  ;;  %v3583_v36 = vld [vmem:[%s5412_s4 + $0x14] sm:$0xf]  ;;  %v2571_v32 = vrot.slane %v4618_v11, 1 }
 0x114   : > { %v4860_v44 = vsel %vm2356_vm4, %v2384_v2, %v2386_v8  ;;  %v4863_v7 = vsel %vm2356_vm4, %v2386_v8, %v2388_v27  ;;  %v2728_v29 = vrot.slane %v4669_v55, 1  ;;  %v5424_v6 = vrot.slane %v4562_v38, 1 }
 0x115   : > { %v4879_v54 = vsel %vm2356_vm4, %v2570_v3, %v2571_v32  ;;  %v5425_v3 = vrot.slane %v4652_v40, 7 }
 0x116   : > { %3932 = vmatmul.mubr.msk.f32.vlgmr.msra.gmra.mrb[10].mxu1 %vm1280_vm2, %v4618_v11  ;;  %3993 = vmatmul.mubr.msk.f32.gmra.mrb[32].mxu0 %vm1280_vm2, %v4681_v0  ;;  %v4884_v2 = vsel %vm2356_vm4, %v2571_v32, %v5424_v6  ;;  %v4889_v11 = vsel %vm2356_vm4, %v2388_v27, %v2728_v29 }
 0x117   : > { %3956 = vmatpush3.msk.msra.mxu1 %vm1329_vm1, %v4735_v34  ;;  %3934 = vmatprep.mubr.msk.f32.mxu1 %vm1280_vm2, %v4562_v38 }
 0x118   : > { %3995 = vmatprep.mubr.msk.f32.mxu0 %vm1280_vm2, %v4718_v21  ;;  %4059 = vmatprep.subr.msk.mxu1 %vm1329_vm1, %v3583_v36 }
 0x11a   : > { %3935 = vmatmul.mubr.msk.f32.gmra.mrb[12].mxu1 %vm1280_vm2, %v4558_v35  ;;  %3996 = vmatmul.mubr.msk.f32.gmra.mrb[34].mxu0 %vm1280_vm2, %v4721_v22  ;;  %v4370_v35 = vmov 0.0  }
 0x11b   : > { %3937 = vmatprep.mubr.msk.f32.mxu1 %vm1280_vm2, %v4586_v56  ;;  %3998 = vmatprep.mubr.msk.f32.mxu0 %vm1280_vm2, %v4764_v60  ;;  %v2022_v38 = vrot.slane %v4370_v35, 7 }
 0x11d   : > { %v2024_v34 = vsel %vm1807_vm3, %v2022_v38, %v5425_v3 }
 0x11e   : > { %3938 = vmatmul.mubr.msk.f32.gmra.mrb[14].mxu1 %vm1280_vm2, %v4580_v51  ;;  %3999 = vmatmul.mubr.msk.f32.gmra.mrb[36].mxu0 %vm1280_vm2, %v4767_v1 }
 0x11f   : > { %3940 = vmatprep.mubr.msk.f32.mxu1 %vm1280_vm2, %v4620_v12  ;;  %4001 = vmatprep.mubr.msk.f32.mxu0 %vm1280_vm2, %v4805_v30 }
 0x122   : > { %3941 = vmatmul.mubr.msk.f32.gmra.mrb[16].mxu1 %vm1280_vm2, %v4612_v5  ;;  %4002 = vmatmul.mubr.msk.f32.gmra.mrb[38].mxu0 %vm1280_vm2, %v4808_v31 }
 0x123   : > { %3943 = vmatprep.mubr.msk.f32.mxu1 %vm1280_vm2, %v4645_v33  ;;  %4004 = vmatprep.mubr.msk.f32.mxu0 %vm1280_vm2, %v4844_v16 }
 0x126   : > { %3944 = vmatmul.mubr.msk.f32.gmra.mrb[18].mxu1 %vm1280_vm2, %v4638_v28  ;;  %4005 = vmatmul.mubr.msk.f32.gmra.mrb[40].mxu0 %vm1280_vm2, %v4847_v20 }
 0x127   : > { %3946 = vmatprep.mubr.msk.f32.mxu1 %vm1280_vm2, %v4674_v58  ;;  %4009 = vmatprep.mubr.msk.f32.mxu0 %vm1280_vm2, %v2024_v34 }
 0x12a   : > { %3947 = vmatmul.mubr.msk.f32.gmra.mrb[4].mxu1 %vm1280_vm2, %v4663_v53  ;;  %4010 = vmatmul.mubr.msk.f32.vlgmr.msra.gmra.mrb[26].mxu0 %vm1280_vm2, %v4710_v17 }
 0x12b   : > { %3949 = vmatprep.mubr.msk.f32.mxu1 %vm1280_vm2, %v4712_v10  ;;  %4012 = vmatprep.mubr.msk.f32.mxu0 %vm1280_vm2, %v4649_v37 }
 0x12c   : > { %4034 = vmatpush3.msk.msra.mxu0 %vm1329_vm1, %v4750_v46 }
 0x12e   : > { %3950 = vmatmul.mubr.msk.f32.gmra.mrb[6].mxu1 %vm1280_vm2, %v4699_v14  ;;  %4013 = vmatmul.mubr.msk.f32.gmra.mrb[28].mxu0 %vm1280_vm2, %v4592_v59  ;;  %v3582_v59 = vld [vmem:[%s5412_s4 + $0x8] sm:$0xf] }
 0x12f   : > { %3952 = vmatprep.mubr.msk.f32.mxu1 %vm1280_vm2, %v4756_v52  ;;  %4015 = vmatprep.mubr.msk.f32.mxu0 %vm1280_vm2, %v4627_v18 }
 0x132   : > { %3953 = vmatmul.mubr.msk.f32.gmra.mrb[8].mxu1 %vm1280_vm2, %v4740_v42  ;;  %4016 = vmatmul.mubr.msk.f32.gmra.mrb[30].mxu0 %vm1280_vm2, %v4636_v24 }
 0x133   : > { %3957 = vmatprep.mubr.msk.f32.mxu1 %vm1280_vm2, %v4586_v56  ;;  %4018 = vmatprep.mubr.msk.f32.mxu0 %vm1280_vm2, %v4655_v41  ;;  %v5426_v56 = vld [vmem:[#allocation2_spill] sm:$0xff] }
 0x136   : > { %3958 = vmatmul.mubr.msk.f32.vlgmr.msra.gmra.mrb[10].mxu1 %vm1280_vm2, %v4580_v51  ;;  %4019 = vmatmul.mubr.msk.f32.gmra.mrb[32].mxu0 %vm1280_vm2, %v4672_v57  ;;  %v3618_v51 = vld [vmem:[%s5412_s4 + $0x20] sm:$0xf] }
 0x137   : > { %4060 = vmatpush3.msk.msra.mxu1 %vm1329_vm1, %v3583_v36  ;;  %3960 = vmatprep.mubr.msk.f32.mxu1 %vm1280_vm2, %v4620_v12 }
 0x138   : > { %4021 = vmatprep.mubr.msk.f32.mxu0 %vm1280_vm2, %v4678_v61  ;;  %4085 = vmatprep.subr.msk.mxu1 %vm1329_vm1, %v3582_v59 }
 0x13a   : > { %3961 = vmatmul.mubr.msk.f32.gmra.mrb[12].mxu1 %vm1280_vm2, %v4612_v5  ;;  %4022 = vmatmul.mubr.msk.f32.gmra.mrb[34].mxu0 %vm1280_vm2, %v4681_v0  ;;  %v5427_v5 = vld [vmem:[#allocation3_spill] sm:$0xff] }
 0x13b   : > { %3963 = vmatprep.mubr.msk.f32.mxu1 %vm1280_vm2, %v4645_v33  ;;  %4024 = vmatprep.mubr.msk.f32.mxu0 %vm1280_vm2, %v4718_v21 }
 0x13e   : > { %3964 = vmatmul.mubr.msk.f32.gmra.mrb[14].mxu1 %vm1280_vm2, %v4638_v28  ;;  %4025 = vmatmul.mubr.msk.f32.gmra.mrb[36].mxu0 %vm1280_vm2, %v4721_v22 }
 0x13f   : > { %3966 = vmatprep.mubr.msk.f32.mxu1 %vm1280_vm2, %v4674_v58  ;;  %4027 = vmatprep.mubr.msk.f32.mxu0 %vm1280_vm2, %v4764_v60 }
 0x142   : > { %3967 = vmatmul.mubr.msk.f32.gmra.mrb[16].mxu1 %vm1280_vm2, %v4663_v53  ;;  %4028 = vmatmul.mubr.msk.f32.gmra.mrb[38].mxu0 %vm1280_vm2, %v4767_v1 }
 0x143   : > { %3969 = vmatprep.mubr.msk.f32.mxu1 %vm1280_vm2, %v4712_v10  ;;  %4030 = vmatprep.mubr.msk.f32.mxu0 %vm1280_vm2, %v4805_v30 }
 0x146   : > { %3970 = vmatmul.mubr.msk.f32.gmra.mrb[18].mxu1 %vm1280_vm2, %v4699_v14  ;;  %4031 = vmatmul.mubr.msk.f32.gmra.mrb[40].mxu0 %vm1280_vm2, %v4808_v31  ;;  %v971_v14 = vlaneseq }
 0x147   : > { %3972 = vmatprep.mubr.msk.f32.mxu1 %vm1280_vm2, %v4756_v52  ;;  %4035 = vmatprep.mubr.msk.f32.mxu0 %vm1280_vm2, %v4627_v18 }
 0x14a   : > { %3973 = vmatmul.mubr.msk.f32.gmra.mrb[4].mxu1 %vm1280_vm2, %v4740_v42  ;;  %4036 = vmatmul.mubr.msk.f32.vlgmr.msra.gmra.mrb[26].mxu0 %vm1280_vm2, %v4636_v24 }
 0x14b   : > { %3975 = vmatprep.mubr.msk.f32.mxu1 %vm1280_vm2, %v4800_v62  ;;  %4038 = vmatprep.mubr.msk.f32.mxu0 %vm1280_vm2, %v4655_v41 }
 0x14e   : > { %3976 = vmatmul.mubr.msk.f32.gmra.mrb[6].mxu1 %vm1280_vm2, %v4791_v15  ;;  %4039 = vmatmul.mubr.msk.f32.gmra.mrb[28].mxu0 %vm1280_vm2, %v4672_v57 }
 0x14f   : > { %4041 = vmatprep.mubr.msk.f32.mxu0 %vm1280_vm2, %v4678_v61  ;;  %3978 = vmatprep.mubr.msk.f32.mxu1 %vm1280_vm2, %v4705_v43 }
 0x152   : > { %3979 = vmatmul.mubr.msk.f32.gmra.mrb[8].mxu1 %vm1280_vm2, %v4669_v55  ;;  %4042 = vmatmul.mubr.msk.f32.gmra.mrb[30].mxu0 %vm1280_vm2, %v4681_v0 }
 0x153   : > { %4044 = vmatprep.mubr.msk.f32.mxu0 %vm1280_vm2, %v4718_v21  ;;  %4061 = vmatprep.mubr.msk.f32.mxu1 %vm1280_vm2, %v4605_v63 }
 0x156   : > { %4045 = vmatmul.mubr.msk.f32.gmra.mrb[32].mxu0 %vm1280_vm2, %v4721_v22  ;;  %4062 = vmatmul.mubr.msk.f32.vlgmr.msra.gmra.mrb[20].mxu1 %vm1280_vm2, %v4689_v4  ;;  %v5150_v22 = vshrl.u32 %v971_v14, 7 }
 0x157   : > { %4086 = vmatpush3.msk.msra.mxu1 %vm1329_vm1, %v3582_v59  ;;  %4047 = vmatprep.mubr.msk.f32.mxu0 %vm1280_vm2, %v4764_v60 }
 0x158   : > { %4064 = vmatprep.mubr.msk.f32.mxu1 %vm1280_vm2, %v4696_v9  ;;  %4111 = vmatprep.subr.msk.mxu1 %vm1329_vm1, %v3618_v51  ;;  %v992_v52 = vand.u32 15, %v5150_v22  ;;  %v974_v60 = vadd.s32 16, %v5150_v22  ;;  %v976_v62 = vadd.s32 32, %v5150_v22  ;;  %v978_v8 = vadd.s32 48, %v5150_v22 }
 0x15a   : > { %4048 = vmatmul.mubr.msk.f32.gmra.mrb[34].mxu0 %vm1280_vm2, %v4767_v1  ;;  %4065 = vmatmul.mubr.msk.f32.gmra.mrb[22].mxu1 %vm1280_vm2, %v4726_v23  ;;  %vm1180_vm5 = vcmp.gt.s32.totalorder %v992_v52, 0  ;;  %v1006_v15 = vand.u32 15, %v974_v60 }
 0x15b   : > { %4050 = vmatprep.mubr.msk.f32.mxu0 %vm1280_vm2, %v4805_v30  ;;  %4067 = vmatprep.mubr.msk.f32.mxu1 %vm1280_vm2, %v4753_v47 }
 0x15c   : > { %vm1182_vm6 = vcmp.gt.s32.totalorder %v1006_v15, 0 }
 0x15e   : > { %4051 = vmatmul.mubr.msk.f32.gmra.mrb[36].mxu0 %vm1280_vm2, %v4808_v31  ;;  %4068 = vmatmul.mubr.msk.f32.gmra.mrb[24].mxu1 %vm1280_vm2, %v4776_v25 }
 0x15f   : > { %4053 = vmatprep.mubr.msk.f32.mxu0 %vm1280_vm2, %v4844_v16  ;;  %4070 = vmatprep.mubr.msk.f32.mxu1 %vm1280_vm2, %v4779_v26 }
 0x162   : > { %4054 = vmatmul.mubr.msk.f32.gmra.mrb[38].mxu0 %vm1280_vm2, %v4847_v20  ;;  %4071 = vmatmul.mubr.msk.f32.gmra.mrb[26].mxu1 %vm1280_vm2, %v4788_v13 }
 0x163   : > { %4056 = vmatprep.mubr.msk.f32.mxu0 %vm1280_vm2, %v4834_v48  ;;  %4073 = vmatprep.mubr.msk.f32.mxu1 %vm1280_vm2, %v4813_v39  ;;  %v1020_v48 = vand.u32 15, %v976_v62 }
 0x165   : > { %vm1184_vm7 = vcmp.gt.s32.totalorder %v1020_v48, 0  ;;  %v973_v48 = vadd.s32 8, %v5150_v22 }
 0x166   : > { %4057 = vmatmul.mubr.msk.f32.gmra.mrb[40].mxu0 %vm1280_vm2, %v4816_v19  ;;  %4074 = vmatmul.mubr.msk.f32.gmra.mrb[28].mxu1 %vm1280_vm2, %v5426_v56  ;;  %v3459_v19 = vsel %vm1180_vm5, 1.0, %v4370_v35  ;;  %v3461_v34 = vsel %vm1184_vm7, 1.0, %v4370_v35 }
 0x167   : > { %4076 = vmatprep.mubr.msk.f32.mxu1 %vm1280_vm2, %v5427_v5 }
 0x16a   : > { %4077 = vmatmul.mubr.msk.f32.gmra.mrb[30].mxu1 %vm1280_vm2, %v4850_v49 }
 0x16b   : > { %4079 = vmatprep.mubr.msk.f32.mxu1 %vm1280_vm2, %v4854_v50 }
 0x16e   : > { %4080 = vmatmul.mubr.msk.f32.gmra.mrb[32].mxu1 %vm1280_vm2, %v4857_v45 }
 0x16f   : > { %4082 = vmatprep.mubr.msk.f32.mxu1 %vm1280_vm2, %v4860_v44 }
 0x172   : > { %4083 = vmatmul.mubr.msk.f32.gmra.mrb[34].mxu1 %vm1280_vm2, %v4863_v7 }
 0x173   : > { %4087 = vmatprep.mubr.msk.f32.mxu1 %vm1280_vm2, %v4879_v54  ;;  %v980_v54 = vadd.s32 64, %v5150_v22 }
 0x176   : > { %4088 = vmatmul.mubr.msk.f32.vlgmr.msra.gmra.mrb[20].mxu1 %vm1280_vm2, %v4884_v2 }
 0x177   : > { %4112 = vmatpush3.msk.msra.mxu1 %vm1329_vm1, %v3618_v51  ;;  %4090 = vmatprep.mubr.msk.f32.mxu1 %vm1280_vm2, %v4605_v63  ;;  %v2730_v63 = vrot.slane %v4370_v35, 1 }
 0x179   : > { %v2731_v12 = vsel %vm2356_vm4, %v2728_v29, %v2730_v63  ;;  %v1034_v29 = vand.u32 15, %v978_v8  ;;  %v999_v8 = vand.u32 15, %v973_v48 }
 0x17a   : > { %4091 = vmatmul.mubr.msk.f32.gmra.mrb[22].mxu1 %vm1280_vm2, %v4689_v4 }
 0x17b   : > { %4093 = vmatprep.mubr.msk.f32.mxu1 %vm1280_vm2, %v4696_v9  ;;  %vm1186_vm8 = vcmp.gt.s32.totalorder %v1034_v29, 0  ;;  %vm1229_vm13 = vcmp.lt.s32.totalorder %v999_v8, 15 }
 0x17e   : > { %4094 = vmatmul.mubr.msk.f32.gmra.mrb[24].mxu1 %vm1280_vm2, %v4726_v23 }
 0x17f   : > { %4096 = vmatprep.mubr.msk.f32.mxu1 %vm1280_vm2, %v4753_v47 }
 0x182   : > { %4097 = vmatmul.mubr.msk.f32.gmra.mrb[26].mxu1 %vm1280_vm2, %v4776_v25 }
 0x183   : > { %4099 = vmatprep.mubr.msk.f32.mxu1 %vm1280_vm2, %v4779_v26 }
 0x186   : > { %4100 = vmatmul.mubr.msk.f32.gmra.mrb[28].mxu1 %vm1280_vm2, %v4788_v13 }
 0x187   : > { %4102 = vmatprep.mubr.msk.f32.mxu1 %vm1280_vm2, %v4813_v39 }
 0x18a   : > { %4103 = vmatmul.mubr.msk.f32.gmra.mrb[30].mxu1 %vm1280_vm2, %v5426_v56 }
 0x18b   : > { %4105 = vmatprep.mubr.msk.f32.mxu1 %vm1280_vm2, %v5427_v5 }
 0x18e   : > { %4106 = vmatmul.mubr.msk.f32.gmra.mrb[32].mxu1 %vm1280_vm2, %v4850_v49 }
 0x18f   : > { %4108 = vmatprep.mubr.msk.f32.mxu1 %vm1280_vm2, %v4854_v50 }
 0x192   : > { %4109 = vmatmul.mubr.msk.f32.gmra.mrb[34].mxu1 %vm1280_vm2, %v4857_v45 }
 0x193   : > { %4113 = vmatprep.mubr.msk.f32.mxu1 %vm1280_vm2, %v4696_v9 }
 0x196   : > { %4114 = vmatmul.mubr.msk.f32.vlgmr.msra.gmra.mrb[20].mxu1 %vm1280_vm2, %v4726_v23 }
 0x197   : > { %4116 = vmatprep.mubr.msk.f32.mxu1 %vm1280_vm2, %v4753_v47 }
 0x19a   : > { %4117 = vmatmul.mubr.msk.f32.gmra.mrb[22].mxu1 %vm1280_vm2, %v4776_v25 }
 0x19b   : > { %4119 = vmatprep.mubr.msk.f32.mxu1 %vm1280_vm2, %v4779_v26 }
 0x19e   : > { %4120 = vmatmul.mubr.msk.f32.gmra.mrb[24].mxu1 %vm1280_vm2, %v4788_v13 }
 0x19f   : > { %4122 = vmatprep.mubr.msk.f32.mxu1 %vm1280_vm2, %v4813_v39 }
 0x1a2   : > { %4123 = vmatmul.mubr.msk.f32.gmra.mrb[26].mxu1 %vm1280_vm2, %v5426_v56  ;;  %v1048_v56 = vand.u32 15, %v980_v54  ;;  %v5208_v54 = vld [vmem:[%s5415_s7] ss:$0 sm:$0xff] }
 0x1a3   : > { %4125 = vmatprep.mubr.msk.f32.mxu1 %vm1280_vm2, %v5427_v5  ;;  %v982_v5 = vadd.s32 80, %v5150_v22 }
 0x1a4   : > { %vm1188_vm9 = vcmp.gt.s32.totalorder %v1048_v56, 0 }
 0x1a6   : > { %4126 = vmatmul.mubr.msk.f32.gmra.mrb[28].mxu1 %vm1280_vm2, %v4850_v49 }
 0x1a7   : > { %4128 = vmatprep.mubr.msk.f32.mxu1 %vm1280_vm2, %v4854_v50  ;;  %v3020_v50 = vld [vmem:[%s5413_s5] sm:$0xf] }
 0x1a8   : > { %4137 = vmatprep.subr.msk.mxu0 %vm1329_vm1, %v3020_v50 }
 0x1a9   : > { %4138 = vmatpush3.msk.msra.mxu0 %vm1329_vm1, %v3020_v50 }
 0x1aa   : > { %4129 = vmatmul.mubr.msk.f32.gmra.mrb[30].mxu1 %vm1280_vm2, %v4857_v45 }
 0x1ab   : > { %4131 = vmatprep.mubr.msk.f32.mxu1 %vm1280_vm2, %v4860_v44 }
 0x1ae   : > { %4132 = vmatmul.mubr.msk.f32.gmra.mrb[32].mxu1 %vm1280_vm2, %v4863_v7  ;;  %v3460_v7 = vsel %vm1182_vm6, 1.0, %v4370_v35 }
 0x1af   : > { %4134 = vmatprep.mubr.msk.f32.mxu1 %vm1280_vm2, %v4889_v11 }
 0x1b2   : > { %4135 = vmatmul.mubr.msk.f32.gmra.mrb[34].mxu1 %vm1280_vm2, %v2731_v12 }
 0x1c9   : > { %v3907_v18 = vpop.f32.mrb[16].mxu0 }
 0x1ca   : > { %v1399_v24 = vpop.f32.mrb[17].mxu0 }
 0x1cd   : > { %v3910_v28 = vpop.f32.mrb[18].mxu0 }
 0x1ce   : > { %v1409_v33 = vpop.f32.mrb[19].mxu0 }
 0x1d1   : > { %v3913_v37 = vpop.f32.mrb[20].mxu0 }
 0x1d2   : > { %v1419_v40 = vpop.f32.mrb[21].mxu0 }
 0x1d5   : > { %v3916_v41 = vpop.f32.mrb[22].mxu0 }
 0x1d6   : > { %v1429_v53 = vpop.f32.mrb[23].mxu0 }
 0x1d9   : > { %v3919_v55 = vpop.f32.mrb[24].mxu0 }
 0x1da   : > { %v1439_v57 = vpop.f32.mrb[25].mxu0 }
 0x209   : > { %v3959_v58 = vpop.f32.mrb[10].mxu1 }
 0x20a   : > { %v4177_v61 = vadd.f32 %v3959_v58, %v3907_v18  ;;  %v1709_v0 = vpop.f32.mrb[11].mxu1  ;;  %v3463_v58 = vsel %vm1188_vm9, 1.0, %v4370_v35 }
 0x20b   : > { %v4178_v4 = vadd.f32 %v1709_v0, %v1399_v24 }
 0x20d   : > { %v3962_v9 = vpop.f32.mrb[12].mxu1 }
 0x20e   : > { %v4179_v43 = vadd.f32 %v3962_v9, %v3910_v28  ;;  %v1719_v17 = vpop.f32.mrb[13].mxu1  ;;  %v3462_v28 = vsel %vm1186_vm8, 1.0, %v4370_v35 }
 0x20f   : > { %v4180_v10 = vadd.f32 %v1719_v17, %v1409_v33 }
 0x211   : > { %v3965_v21 = vpop.f32.mrb[14].mxu1 }
 0x212   : > { %v4181_v23 = vadd.f32 %v3965_v21, %v3913_v37  ;;  %v1729_v42 = vpop.f32.mrb[15].mxu1  ;;  %v1062_v37 = vand.u32 15, %v982_v5  ;;  %v981_v5 = vadd.s32 72, %v5150_v22 }
 0x213   : > { %v4182_v46 = vadd.f32 %v1729_v42, %v1419_v40  ;;  %v984_v40 = vadd.s32 96, %v5150_v22 }
 0x214   : > { %vm1190_vm10 = vcmp.gt.s32.totalorder %v1062_v37, 0 }
 0x215   : > { %v3968_v47 = vpop.f32.mrb[16].mxu1  ;;  %v1076_v0 = vand.u32 15, %v984_v40 }
 0x216   : > { %v4183_v1 = vadd.f32 %v3968_v47, %v3916_v41  ;;  %v1739_v25 = vpop.f32.mrb[17].mxu1 }
 0x217   : > { %v4184_v26 = vadd.f32 %v1739_v25, %v1429_v53  ;;  %vm1192_vm11 = vcmp.gt.s32.totalorder %v1076_v0, 0 }
 0x218   : > { %v3465_v60 = vsel %vm1192_vm11, 1.0, %v4370_v35 }
 0x219   : > { %v3971_v13 = vpop.f32.mrb[18].mxu1 }
 0x21a   : > { %v4185_v30 = vadd.f32 %v3971_v13, %v3919_v55  ;;  %v1749_v31 = vpop.f32.mrb[19].mxu1 }
 0x21b   : > { %v4186_v39 = vadd.f32 %v1749_v31, %v1439_v57 }
 0x21d   : > { %v3974_v44 = vpop.f32.mrb[4].mxu1  ;;  %v4037_v45 = vpop.f32.mrb[26].mxu0 }
 0x21e   : > { %v5157_v27 = vadd.f32 %v4177_v61, %v4037_v45  ;;  %v1759_v16 = vpop.f32.mrb[5].mxu1  ;;  %v2257_v20 = vpop.f32.mrb[27].mxu0 }
 0x21f   : > { %v2900_v49 = vmul.f32 %v3459_v19, %v2257_v20 }
 0x221   : > { %v3977_v36 = vpop.f32.mrb[6].mxu1  ;;  %v4040_v32 = vpop.f32.mrb[28].mxu0  ;;  %v5161_v6 = vadd.f32 %v4178_v4, %v2900_v49  ;;  %v986_v4 = vadd.s32 112, %v5150_v22  ;;  %v977_v49 = vadd.s32 40, %v5150_v22 }
 0x222   : > { %v5163_v2 = vadd.f32 %v4179_v43, %v4040_v32  ;;  %v1769_v11 = vpop.f32.mrb[7].mxu1  ;;  %v2267_v38 = vpop.f32.mrb[29].mxu0  ;;  %v979_v32 = vadd.s32 56, %v5150_v22 }
 0x223   : > { %v2902_v3 = vmul.f32 %v3460_v7, %v2267_v38  ;;  %v3467_v7 = vsel %vm1229_vm13, 1.0, %v4370_v35 }
 0x224   : > { %v1041_v56 = vand.u32 15, %v979_v32 }
 0x225   : > { %v3980_v59 = vpop.f32.mrb[8].mxu1  ;;  %v4043_v51 = vpop.f32.mrb[30].mxu0  ;;  %v5167_v63 = vadd.f32 %v4180_v10, %v2902_v3  ;;  %v3464_v10 = vsel %vm1190_vm10, 1.0, %v4370_v35 }
 0x226   : > { %v5169_v12 = vadd.f32 %v4181_v23, %v4043_v51  ;;  %v1779_v50 = vpop.f32.mrb[9].mxu1  ;;  %v2277_v18 = vpop.f32.mrb[31].mxu0  ;;  %v1090_v23 = vand.u32 15, %v986_v4  ;;  %vm1235_vm1 = vcmp.lt.s32.totalorder %v1041_v56, 15 }
 0x227   : > { %v2904_v24 = vmul.f32 %v3461_v34, %v2277_v18 }
 0x228   : > { %vm1194_vm12 = vcmp.gt.s32.totalorder %v1090_v23, 0 }
 0x229   : > { %v4046_v33 = vpop.f32.mrb[32].mxu0  ;;  %v5173_v41 = vadd.f32 %v4182_v46, %v2904_v24  ;;  %v3466_v62 = vsel %vm1194_vm12, 1.0, %v4370_v35 }
 0x22a   : > { %v5175_v53 = vadd.f32 %v4183_v1, %v4046_v33  ;;  %v2287_v55 = vpop.f32.mrb[33].mxu0 }
 0x22b   : > { %v2906_v57 = vmul.f32 %v3462_v28, %v2287_v55  ;;  %v983_v55 = vadd.s32 88, %v5150_v22 }
 0x22d   : > { %v4049_v61 = vpop.f32.mrb[34].mxu0  ;;  %v5179_v9 = vadd.f32 %v4184_v26, %v2906_v57 }
 0x22e   : > { %v5181_v14 = vadd.f32 %v4185_v30, %v4049_v61  ;;  %v2297_v43 = vpop.f32.mrb[35].mxu0 }
 0x22f   : > { %v2908_v17 = vmul.f32 %v3463_v58, %v2297_v43  ;;  %v1055_v58 = vand.u32 15, %v981_v5 }
 0x231   : > { %v4052_v21 = vpop.f32.mrb[36].mxu0  ;;  %v5184_v42 = vadd.f32 %v4186_v39, %v2908_v17  ;;  %vm1237_vm3 = vcmp.lt.s32.totalorder %v1055_v58, 15 }
 0x232   : > { %v5186_v46 = vadd.f32 %v4052_v21, %v3974_v44  ;;  %v2307_v47 = vpop.f32.mrb[37].mxu0 }
 0x233   : > { %v2910_v52 = vmul.f32 %v3464_v10, %v2307_v47  ;;  %v3470_v47 = vsel %vm1235_vm1, 1.0, %v4370_v35 }
 0x235   : > { %v4055_v1 = vpop.f32.mrb[38].mxu0  ;;  %v5189_v25 = vadd.f32 %v2910_v52, %v1759_v16  ;;  %v975_v16 = vadd.s32 24, %v5150_v22 }
 0x236   : > { %v5191_v26 = vadd.f32 %v4055_v1, %v3977_v36  ;;  %v2317_v13 = vpop.f32.mrb[39].mxu0  ;;  %v1027_v36 = vand.u32 15, %v977_v49  ;;  %v985_v1 = vadd.s32 104, %v5150_v22 }
 0x237   : > { %v2912_v15 = vmul.f32 %v3465_v60, %v2317_v13  ;;  %v1013_v20 = vand.u32 15, %v975_v16 }
 0x238   : > { %vm1233_vm15 = vcmp.lt.s32.totalorder %v1027_v36, 15  ;;  %v987_v36 = vadd.s32 120, %v5150_v22 }
 0x239   : > { %v4058_v30 = vpop.f32.mrb[40].mxu0  ;;  %v5194_v31 = vadd.f32 %v2912_v15, %v1769_v11  ;;  %vm1231_vm14 = vcmp.lt.s32.totalorder %v1013_v20, 15  ;;  %v3469_v40 = vsel %vm1233_vm15, 1.0, %v4370_v35 }
 0x23a   : > { %v5196_v39 = vadd.f32 %v4058_v30, %v3980_v59  ;;  %v2327_v19 = vpop.f32.mrb[41].mxu0  ;;  %v3468_v34 = vsel %vm1231_vm14, 1.0, %v4370_v35  ;;  %v5215_v59 = vld [vmem:[%s5415_s7 + $0x1] ss:$0 sm:$0xff] }
 0x23b   : > { %v2914_v44 = vmul.f32 %v3466_v62, %v2327_v19 }
 0x23d   : > { %v5198_v45 = vadd.f32 %v2914_v44, %v1779_v50 }
 0x269   : > { %v4115_v29 = vpop.f32.mrb[20].mxu1 }
 0x26a   : > { %v2933_v11 = vmul.f32 %v4115_v29, %v3467_v7  ;;  %v2805_v38 = vpop.f32.mrb[21].mxu1  ;;  %v1083_v7 = vand.u32 15, %v985_v1 }
 0x26b   : > { %v2948_v3 = vadd.f32 %v5161_v6, %v2805_v38 }
 0x26c   : > { %v2949_v51 = vadd.f32 %v2933_v11, %v5157_v27  ;;  %vm1241_vm5 = vcmp.lt.s32.totalorder %v1083_v7, 15 }
 0x26d   : > { %v2968_v50 = vmul.f32 %v5208_v54, %v2948_v3  ;;  %v4118_v18 = vpop.f32.mrb[22].mxu1 }
 0x26e   : > { %v2969_v24 = vmul.f32 %v5208_v54, %v2949_v51  ;;  %v2935_v28 = vmul.f32 %v4118_v18, %v3468_v34  ;;  %v2815_v6 = vpop.f32.mrb[23].mxu1 }
 0x26f   : > { %v2988_v33 = vadd.f32 %v5215_v59, %v2968_v50  ;;  %v2950_v37 = vadd.f32 %v5167_v63, %v2815_v6  ;;  %v1097_v50 = vand.u32 15, %v987_v36 }
 0x270   : > { %v2989_v27 = vadd.f32 %v5215_v59, %v2969_v24  ;;  %v2951_v57 = vadd.f32 %v2935_v28, %v5163_v2  ;;  %v1069_v2 = vand.u32 15, %v983_v55 }
 0x271   : > { %v3004_v61 = vmax.f32 %v2988_v33, 0.0  ;;  %v2970_v0 = vmul.f32 %v5208_v54, %v2950_v37  ;;  %v4121_v4 = vpop.f32.mrb[24].mxu1  ;;  %vm1243_vm6 = vcmp.lt.s32.totalorder %v1097_v50, 15 }
 0x272   : > { %v3005_v43 = vmax.f32 %v2989_v27, 0.0  ;;  %v2971_v17 = vmul.f32 %v5208_v54, %v2951_v57  ;;  %v2937_v10 = vmul.f32 %v4121_v4, %v3469_v40  ;;  %v2825_v21 = vpop.f32.mrb[25].mxu1  ;;  %vm5243_vm4 = vcmp.lt.s32.totalorder %v1069_v2, 15 }
 0x273   : > { %v2990_v63 = vadd.f32 %v5215_v59, %v2970_v0  ;;  %v2952_v23 = vadd.f32 %v5173_v41, %v2825_v21  ;;  %4139 = vmatprep.mubr.msk.f32.mxu0 %vm1280_vm2, %v3004_v61 }
 0x274   : > { %v2991_v52 = vadd.f32 %v5215_v59, %v2971_v17  ;;  %v2953_v60 = vadd.f32 %v2937_v10, %v5169_v12  ;;  %4140 = vmatmul.mubr.msk.f32.vlgmr.msra.gmra.mrb[42].mxu0 %vm1280_vm2, %v3005_v43  ;;  %v3471_v12 = vsel %vm1237_vm3, 1.0, %v4370_v35 }
 0x275   : > { %v3006_v13 = vmax.f32 %v2990_v63, 0.0  ;;  %v2972_v15 = vmul.f32 %v5208_v54, %v2952_v23  ;;  %v4124_v62 = vpop.f32.mrb[26].mxu1 }
 0x276   : > { %v3007_v30 = vmax.f32 %v2991_v52, 0.0  ;;  %v2973_v41 = vmul.f32 %v5208_v54, %v2953_v60  ;;  %v2939_v19 = vmul.f32 %v4124_v62, %v3470_v47  ;;  %v2835_v44 = vpop.f32.mrb[27].mxu1 }
 0x277   : > { %v2992_v48 = vadd.f32 %v5215_v59, %v2972_v15  ;;  %v2954_v8 = vadd.f32 %v5179_v9, %v2835_v44  ;;  %4142 = vmatprep.mubr.msk.f32.mxu0 %vm1280_vm2, %v3006_v13 }
 0x278   : > { %v2993_v20 = vadd.f32 %v5215_v59, %v2973_v41  ;;  %v2955_v49 = vadd.f32 %v2939_v19, %v5175_v53  ;;  %4143 = vmatmul.mubr.msk.f32.gmra.mrb[44].mxu0 %vm1280_vm2, %v3007_v30  ;;  %v3472_v53 = vsel %vm5243_vm4, 1.0, %v4370_v35 }
 0x279   : > { %v3008_v32 = vmax.f32 %v2992_v48, 0.0  ;;  %v2974_v9 = vmul.f32 %v5208_v54, %v2954_v8  ;;  %v4127_v29 = vpop.f32.mrb[28].mxu1 }
 0x27a   : > { %v3009_v11 = vmax.f32 %v2993_v20, 0.0  ;;  %v2975_v38 = vmul.f32 %v5208_v54, %v2955_v49  ;;  %v2941_v3 = vmul.f32 %v4127_v29, %v3471_v12  ;;  %v2845_v34 = vpop.f32.mrb[29].mxu1 }
 0x27b   : > { %v2994_v51 = vadd.f32 %v5215_v59, %v2974_v9  ;;  %v2956_v56 = vadd.f32 %v5184_v42, %v2845_v34  ;;  %4145 = vmatprep.mubr.msk.f32.mxu0 %vm1280_vm2, %v3008_v32  ;;  %v4314_v9 = vld [vmem:[%s4475_s17 + $0x8] sm:$0xff] }
 0x27c   : > { %v2995_v22 = vadd.f32 %v5215_v59, %v2975_v38  ;;  %v2957_v5 = vadd.f32 %v2941_v3, %v5181_v14  ;;  %4146 = vmatmul.mubr.msk.f32.gmra.mrb[46].mxu0 %vm1280_vm2, %v3009_v11  ;;  %v3473_v14 = vsel %vm1241_vm5, 1.0, %v4370_v35  ;;  %v4315_v3 = vld [vmem:[%s4475_s17] sm:$0xff] }
 0x27d   : > { %v3010_v18 = vmax.f32 %v2994_v51, 0.0  ;;  %v2976_v24 = vmul.f32 %v5208_v54, %v2956_v56  ;;  %v4130_v28 = vpop.f32.mrb[30].mxu1 }
 0x27e   : > { %v3011_v6 = vmax.f32 %v2995_v22, 0.0  ;;  %v2977_v42 = vmul.f32 %v5208_v54, %v2957_v5  ;;  %v2943_v33 = vmul.f32 %v4130_v28, %v3472_v53  ;;  %v2855_v37 = vpop.f32.mrb[31].mxu1 }
 0x27f   : > { %v2996_v40 = vadd.f32 %v5215_v59, %v2976_v24  ;;  %v2958_v55 = vadd.f32 %v5189_v25, %v2855_v37  ;;  %4148 = vmatprep.mubr.msk.f32.mxu0 %vm1280_vm2, %v3010_v18  ;;  %v4316_v18 = vld [vmem:[%s4475_s17 + $0x18] sm:$0xff] }
 0x280   : > { %v2997_v27 = vadd.f32 %v5215_v59, %v2977_v42  ;;  %v2959_v57 = vadd.f32 %v2943_v33, %v5186_v46  ;;  %4149 = vmatmul.mubr.msk.f32.gmra.mrb[48].mxu0 %vm1280_vm2, %v3011_v6  ;;  %v3474_v46 = vsel %vm1243_vm6, 1.0, %v4370_v35  ;;  %v4317_v42 = vld [vmem:[%s4475_s17 + $0x10] sm:$0xff] }
 0x281   : > { %v3012_v58 = vmax.f32 %v2996_v40, 0.0  ;;  %v2978_v61 = vmul.f32 %v5208_v54, %v2958_v55  ;;  %v4133_v0 = vpop.f32.mrb[32].mxu1 }
 0x282   : > { %v3013_v4 = vmax.f32 %v2997_v27, 0.0  ;;  %v2979_v43 = vmul.f32 %v5208_v54, %v2959_v57  ;;  %v2945_v17 = vmul.f32 %v4133_v0, %v3473_v14  ;;  %v2865_v25 = vpop.f32.mrb[33].mxu1 }
 0x283   : > { %v2998_v10 = vadd.f32 %v5215_v59, %v2978_v61  ;;  %v2960_v21 = vadd.f32 %v5194_v31, %v2865_v25  ;;  %4151 = vmatprep.mubr.msk.f32.mxu0 %vm1280_vm2, %v3012_v58  ;;  %v4318_v58 = vld [vmem:[%s4475_s17 + $0x28] sm:$0xff] }
 0x284   : > { %v2999_v63 = vadd.f32 %v5215_v59, %v2979_v43  ;;  %v2961_v23 = vadd.f32 %v2945_v17, %v5191_v26  ;;  %4152 = vmatmul.mubr.msk.f32.gmra.mrb[50].mxu0 %vm1280_vm2, %v3013_v4  ;;  %v4319_v43 = vld [vmem:[%s4475_s17 + $0x20] sm:$0xff] }
 0x285   : > { %v3014_v47 = vmax.f32 %v2998_v10, 0.0  ;;  %v2980_v2 = vmul.f32 %v5208_v54, %v2960_v21  ;;  %v4136_v52 = vpop.f32.mrb[34].mxu1 }
 0x286   : > { %v3015_v60 = vmax.f32 %v2999_v63, 0.0  ;;  %v2981_v1 = vmul.f32 %v5208_v54, %v2961_v23  ;;  %v2947_v13 = vmul.f32 %v4136_v52, %v3474_v46  ;;  %v2875_v15 = vpop.f32.mrb[35].mxu1 }
 0x287   : > { %v3000_v31 = vadd.f32 %v5215_v59, %v2980_v2  ;;  %v2962_v62 = vadd.f32 %v5198_v45, %v2875_v15  ;;  %4154 = vmatprep.mubr.msk.f32.mxu0 %vm1280_vm2, %v3014_v47  ;;  %v4320_v47 = vld [vmem:[%s4475_s17 + $0x38] sm:$0xff] }
 0x288   : > { %v3001_v35 = vadd.f32 %v5215_v59, %v2981_v1  ;;  %v2963_v26 = vadd.f32 %v2947_v13, %v5196_v39  ;;  %4155 = vmatmul.mubr.msk.f32.gmra.mrb[52].mxu0 %vm1280_vm2, %v3015_v60  ;;  %v5299_v39 = vld [vmem:[%s5416_s8] ss:$0 sm:$0xff]  ;;  %v4321_v1 = vld [vmem:[%s4475_s17 + $0x30] sm:$0xff] }
 0x289   : > { %v3016_v30 = vmax.f32 %v3000_v31, 0.0  ;;  %v2982_v41 = vmul.f32 %v5208_v54, %v2962_v62 }
 0x28a   : > { %v3017_v19 = vmax.f32 %v3001_v35, 0.0  ;;  %v2983_v44 = vmul.f32 %v5208_v54, %v2963_v26  ;;  %v5304_v54 = vld [vmem:[%s5416_s8 + $0x1] ss:$0 sm:$0xff] }
 0x28b   : > { %v3002_v48 = vadd.f32 %v5215_v59, %v2982_v41  ;;  %4157 = vmatprep.mubr.msk.f32.mxu0 %vm1280_vm2, %v3016_v30  ;;  %v4322_v41 = vld [vmem:[%s4475_s17 + $0x48] sm:$0xff] }
 0x28c   : > { %v3003_v45 = vadd.f32 %v5215_v59, %v2983_v44  ;;  %4158 = vmatmul.mubr.msk.f32.gmra.mrb[54].mxu0 %vm1280_vm2, %v3017_v19 }
 0x28d   : > { %v3018_v8 = vmax.f32 %v3002_v48, 0.0 }
 0x28e   : > { %v3019_v12 = vmax.f32 %v3003_v45, 0.0  ;;  %v4323_v45 = vld [vmem:[%s4475_s17 + $0x40] sm:$0xff] }
 0x28f   : > { %4160 = vmatprep.mubr.msk.f32.mxu0 %vm1280_vm2, %v3018_v8 }
 0x290   : > { %4161 = vmatmul.mubr.msk.f32.gmra.mrb[56].mxu0 %vm1280_vm2, %v3019_v12 }
 0x347   : > { %v4141_v59 = vpop.f32.mrb[42].mxu0 }
 0x348   : > { %v3222_v16 = vmul.f32 %v4141_v59, %v5299_v39  ;;  %v3138_v20 = vpop.f32.mrb[43].mxu0 }
 0x349   : > { %v3221_v49 = vmul.f32 %v5299_v39, %v3138_v20 }
 0x34a   : > { %v3242_v7 = vadd.f32 %v5304_v54, %v3222_v16 }
 0x34b   : > { %v3241_v36 = vadd.f32 %v5304_v54, %v3221_v49  ;;  %v4144_v32 = vpop.f32.mrb[44].mxu0 }
 0x34c   : > { %v3258_v29 = vadd.f32 %v4314_v9, %v3242_v7  ;;  %v3224_v11 = vmul.f32 %v4144_v32, %v5299_v39  ;;  %v3148_v38 = vpop.f32.mrb[45].mxu0 }
 0x34d   : > { %v3257_v34 = vadd.f32 %v4315_v3, %v3241_v36  ;;  %v3223_v51 = vmul.f32 %v5299_v39, %v3148_v38  ;;  %v4324_v36 = vld [vmem:[%s4475_s17 + $0x58] sm:$0xff] }
 0x34e   : > { %v3274_v56 = vmax.f32 %v3258_v29, 0.0  ;;  %v3244_v53 = vadd.f32 %v5304_v54, %v3224_v11  ;;  %v4325_v11 = vld [vmem:[%s4475_s17 + $0x50] sm:$0xff] }
 0x34f   : > { %v3273_v22 = vmax.f32 %v3257_v34, 0.0  ;;  %v3243_v5 = vadd.f32 %v5304_v54, %v3223_v51  ;;  %v4147_v50 = vpop.f32.mrb[46].mxu0 }
 0x350   : > { %3290 = vst.msk [vmem:[%s5317_s30 + $0x8] sm:$0xff] %vm531_vm0, %v3274_v56  ;;  %v3260_v24 = vadd.f32 %v4316_v18, %v3244_v53  ;;  %v3226_v28 = vmul.f32 %v4147_v50, %v5299_v39  ;;  %v3158_v6 = vpop.f32.mrb[47].mxu0 }
 0x351   : > { %3289 = vst.msk [vmem:[%s5317_s30] sm:$0xff] %vm531_vm0, %v3273_v22  ;;  %v3259_v33 = vadd.f32 %v4317_v42, %v3243_v5  ;;  %v3225_v37 = vmul.f32 %v5299_v39, %v3158_v6  ;;  %v4326_v5 = vld [vmem:[%s4475_s17 + $0x68] sm:$0xff] }
 0x352   : > { %v3276_v40 = vmax.f32 %v3260_v24, 0.0  ;;  %v3246_v55 = vadd.f32 %v5304_v54, %v3226_v28  ;;  %v4327_v28 = vld [vmem:[%s4475_s17 + $0x60] sm:$0xff] }
 0x353   : > { %v3275_v14 = vmax.f32 %v3259_v33, 0.0  ;;  %v3245_v27 = vadd.f32 %v5304_v54, %v3225_v37  ;;  %v4150_v57 = vpop.f32.mrb[48].mxu0 }
 0x354   : > { %3292 = vst.msk [vmem:[%s5317_s30 + $0x18] sm:$0xff] %vm531_vm0, %v3276_v40  ;;  %v3262_v61 = vadd.f32 %v4318_v58, %v3246_v55  ;;  %v3228_v0 = vmul.f32 %v4150_v57, %v5299_v39  ;;  %v3168_v4 = vpop.f32.mrb[49].mxu0  ;;  %v4329_v57 = vld [vmem:[%s4475_s17 + $0x70] sm:$0xff] }
 0x355   : > { %3291 = vst.msk [vmem:[%s5317_s30 + $0x10] sm:$0xff] %vm531_vm0, %v3275_v14  ;;  %v3261_v17 = vadd.f32 %v4319_v43, %v3245_v27  ;;  %v3227_v25 = vmul.f32 %v5299_v39, %v3168_v4  ;;  %v4328_v14 = vld [vmem:[%s4475_s17 + $0x78] sm:$0xff] }
 0x356   : > { %v3278_v10 = vmax.f32 %v3262_v61, 0.0  ;;  %v3248_v21 = vadd.f32 %v5304_v54, %v3228_v0 }
 0x357   : > { %v3277_v46 = vmax.f32 %v3261_v17, 0.0  ;;  %v3247_v63 = vadd.f32 %v5304_v54, %v3227_v25  ;;  %v4153_v23 = vpop.f32.mrb[50].mxu0 }
 0x358   : > { %3294 = vst.msk [vmem:[%s5317_s30 + $0x28] sm:$0xff] %vm531_vm0, %v3278_v10  ;;  %v3264_v2 = vadd.f32 %v4320_v47, %v3248_v21  ;;  %v3230_v52 = vmul.f32 %v4153_v23, %v5299_v39  ;;  %v3178_v60 = vpop.f32.mrb[51].mxu0 }
 0x359   : > { %3293 = vst.msk [vmem:[%s5317_s30 + $0x20] sm:$0xff] %vm531_vm0, %v3277_v46  ;;  %v3263_v13 = vadd.f32 %v4321_v1, %v3247_v63  ;;  %v3229_v15 = vmul.f32 %v5299_v39, %v3178_v60 }
 0x35a   : > { %v3280_v31 = vmax.f32 %v3264_v2, 0.0  ;;  %v3250_v62 = vadd.f32 %v5304_v54, %v3230_v52 }
 0x35b   : > { %v3279_v35 = vmax.f32 %v3263_v13, 0.0  ;;  %v3249_v26 = vadd.f32 %v5304_v54, %v3229_v15  ;;  %v4156_v30 = vpop.f32.mrb[52].mxu0 }
 0x35c   : > { %3296 = vst.msk [vmem:[%s5317_s30 + $0x38] sm:$0xff] %vm531_vm0, %v3280_v31  ;;  %v3266_v19 = vadd.f32 %v4322_v41, %v3250_v62  ;;  %v3232_v44 = vmul.f32 %v4156_v30, %v5299_v39  ;;  %v3188_v48 = vpop.f32.mrb[53].mxu0 }
 0x35d   : > { %3295 = vst.msk [vmem:[%s5317_s30 + $0x30] sm:$0xff] %vm531_vm0, %v3279_v35  ;;  %v3265_v8 = vadd.f32 %v4323_v45, %v3249_v26  ;;  %v3231_v12 = vmul.f32 %v5299_v39, %v3188_v48 }
 0x35e   : > { %v3282_v59 = vmax.f32 %v3266_v19, 0.0  ;;  %v3252_v16 = vadd.f32 %v5304_v54, %v3232_v44 }
 0x35f   : > { %v3281_v20 = vmax.f32 %v3265_v8, 0.0  ;;  %v3251_v49 = vadd.f32 %v5304_v54, %v3231_v12  ;;  %v4159_v7 = vpop.f32.mrb[54].mxu0 }
 0x360   : > { %3298 = vst.msk [vmem:[%s5317_s30 + $0x48] sm:$0xff] %vm531_vm0, %v3282_v59  ;;  %v3268_v32 = vadd.f32 %v4324_v36, %v3252_v16  ;;  %v3234_v9 = vmul.f32 %v4159_v7, %v5299_v39  ;;  %v3198_v29 = vpop.f32.mrb[55].mxu0 }
 0x361   : > { %3297 = vst.msk [vmem:[%s5317_s30 + $0x40] sm:$0xff] %vm531_vm0, %v3281_v20  ;;  %v3267_v38 = vadd.f32 %v4325_v11, %v3251_v49  ;;  %v3233_v3 = vmul.f32 %v5299_v39, %v3198_v29 }
 0x362   : > { %v3284_v34 = vmax.f32 %v3268_v32, 0.0  ;;  %v3254_v51 = vadd.f32 %v5304_v54, %v3234_v9 }
 0x363   : > { %v3283_v56 = vmax.f32 %v3267_v38, 0.0  ;;  %v3253_v53 = vadd.f32 %v5304_v54, %v3233_v3  ;;  %v4162_v22 = vpop.f32.mrb[56].mxu0 }
 0x364   : > { %3300 = vst.msk [vmem:[%s5317_s30 + $0x58] sm:$0xff] %vm531_vm0, %v3284_v34  ;;  %v3270_v50 = vadd.f32 %v4326_v5, %v3254_v51  ;;  %v3236_v18 = vmul.f32 %v4162_v22, %v5299_v39  ;;  %v3208_v24 = vpop.f32.mrb[57].mxu0 }
 0x365   : > { %3299 = vst.msk [vmem:[%s5317_s30 + $0x50] sm:$0xff] %vm531_vm0, %v3283_v56  ;;  %v3269_v6 = vadd.f32 %v4327_v28, %v3253_v53  ;;  %v3235_v42 = vmul.f32 %v5299_v39, %v3208_v24 }
 0x366   : > { %v3286_v33 = vmax.f32 %v3270_v50, 0.0  ;;  %v3256_v37 = vadd.f32 %v5304_v54, %v3236_v18 }
 0x367   : > { %v3285_v40 = vmax.f32 %v3269_v6, 0.0  ;;  %v3255_v55 = vadd.f32 %v5304_v54, %v3235_v42 }
 0x368   : > { %3302 = vst.msk [vmem:[%s5317_s30 + $0x68] sm:$0xff] %vm531_vm0, %v3286_v33  ;;  %v3272_v27 = vadd.f32 %v4328_v14, %v3256_v37 }
 0x369   : > { %3301 = vst.msk [vmem:[%s5317_s30 + $0x60] sm:$0xff] %vm531_vm0, %v3285_v40  ;;  %v3271_v58 = vadd.f32 %v4329_v57, %v3255_v55 }
 0x36a   : > { %v3288_v61 = vmax.f32 %v3272_v27, 0.0 }
 0x36b   : > { %v3287_v0 = vmax.f32 %v3271_v58, 0.0 }
 0x36c   : > { %3304 = vst.msk [vmem:[%s5317_s30 + $0x78] sm:$0xff] %vm531_vm0, %v3288_v61 }
 0x36d   : > { %3303 = vst.msk [vmem:[%s5317_s30 + $0x70] sm:$0xff] %vm531_vm0, %v3287_v0 }
 0x36e PF: > { %s19_s13 = sadd.s32 1, %s4368_s13   ;;  %s5430_s30 = smov %s4360_s11 }
 0x36f   : > { %p16_p12 = scmp.ge.s32.totalorder %s19_s13, 6   ;;  %s5431_s10 = smov %s4364_s12 }
 0x370   : > { %s5432_s11 = smov %s5435_s14  ;;  %s5433_s12 = smov %s5439_s15 }
 0x371   :  { %18 = sbr.rel (!%p16_p12) target bundleno = 3 (0x3), region = 100 }

</bundles_post_ra>
